<compile_context>
chip_gen: v7x
topology: tpu7x:2x2x1
jax: 0.10.0
libtpu: 0.0.40
codegen_flags: <defaults>
</compile_context>

<pallas_src>
import jax
import jax.numpy as jnp
from jax.experimental import pallas as pl
from jax.experimental.pallas import tpu as pltpu


def _round_up(x, m):
    return (x + m - 1) // m * m


def _cdiv(a, b):
    return -(-a // b)


TM_TARGET = 4096                   # production tile target (rows on the lane axis)
VMEM_BUDGET = 24 * 1024 * 1024     # heuristic cap for the in-kernel LHS scratch


# ----------------------------- Pallas kernel ------------------------------ #

def _make_stage_kernel(tm, cin_p, cout_p, hp, wp, h128):
    """Fused stage: Conv3d(3,1,1) + bias + PReLU + masked batch-stat
    accumulation, with the previous stage's BatchNorm affine folded into the
    input path.  Data layout is channels-first: (C, flattened padded volume)."""
    sd = hp * wp          # lane stride of one padded depth slice
    sh = wp               # lane stride of one padded H row
    offs = [(kd - 1) * sd + (kh - 1) * sh + (kw - 1)
            for kd in range(3) for kh in range(3) for kw in range(3)]
    assert max(abs(o) for o in offs) <= h128

    def kernel(xl_ref, xc_ref, xr_ref,        # (cin_p, h128/tm/h128) bf16 window
               ml_ref, mc_ref, mr_ref,        # (1, h128/tm/h128) bf16 interior mask
               w_ref,                         # (cout_p, 27*cin_p) bf16, resident
               b_ref,                         # (cout_p, 1) f32
               scale_ref, shift_ref,          # (cin_p, 1) f32 - prev-BN affine
               alpha_ref,                     # (1, 1) f32 in SMEM (PReLU slope)
               y_ref,                         # out (cout_p, tm) bf16, lane-dense
               stats_ref,                     # out (cout_p, 2) f32, resident/core
               lhs_sc):                       # VMEM scratch (27*cin_p, tm) f32
        i = pl.program_id(1)

        @pl.when(i == 0)
        def _init():
            stats_ref[...] = jnp.zeros((cout_p, 2), jnp.float32)

        # Halo window (cin_p, h128 + tm + h128).  Apply the folded previous-stage
        # BN affine and zero every non-interior column with jnp.where so the
        # guard / tail columns (uninitialized HBM for stage 2) map to exactly 0.
        xwin = jnp.concatenate([xl_ref[...], xc_ref[...], xr_ref[...]],
                               axis=1).astype(jnp.float32)
        mwin = jnp.concatenate([ml_ref[...], mc_ref[...], mr_ref[...]], axis=1)
        xwin = jnp.where(mwin > 0, xwin * scale_ref[...] + shift_ref[...], 0.0)

        # Pack the 27 taps into the contraction dim: lane-offset slices of the
        # window written at 8-aligned sublane offsets of the LHS scratch.
        for t, off in enumerate(offs):
            lhs_sc[t * cin_p:(t + 1) * cin_p, :] = \
                xwin[:, h128 + off:h128 + off + tm]

        # Single K=27*cin_p MXU matmul, f32 accumulation, no accumulator RMW.
        acc = jnp.dot(w_ref[...], lhs_sc[...].astype(jnp.bfloat16),
                      preferred_element_type=jnp.float32)          # (cout_p, tm)

        acc = acc + b_ref[...]
        alpha = alpha_ref[0, 0]
        acc = jnp.where(acc > 0.0, acc, alpha * acc)               # PReLU
        acc = jnp.where(mc_ref[...] > 0, acc, 0.0)                 # zero non-interior

        y_ref[...] = acc.astype(y_ref.dtype)                       # lane-dense store

        # Batch-stat partials: two separate slice accumulations (no concatenate).
        stats_ref[:, 0:1] += jnp.sum(acc, axis=1, keepdims=True)
        stats_ref[:, 1:2] += jnp.sum(acc * acc, axis=1, keepdims=True)

    return kernel


# ----------------------------- Pallas wrapper ------------------------------ #

def conv_prelu_stats(x_slab, mask, w_packed, bias, prev_scale, prev_shift, alpha,
                     *, tm, n_tiles, hp, wp, h128):
    """x_slab: (cin_p, R) bf16 channels-first, guard-extended flattened padded
    volume.  Returns (y_slab (cout_p, R) bf16, per-core stats (2, cout_p, 2))."""
    cin_p, r_total = x_slab.shape
    cout_p, k_dim = w_packed.shape
    assert k_dim == 27 * cin_p
    assert tm % h128 == 0 and n_tiles % 2 == 0
    assert r_total == (n_tiles + 2) * tm
    t2 = n_tiles // 2
    r = tm // h128

    kernel = _make_stage_kernel(tm, cin_p, cout_p, hp, wp, h128)

    y, stats = pl.pallas_call(
        kernel,
        grid=(2, t2),
        in_specs=[
            pl.BlockSpec((cin_p, h128), lambda c, i: (0, (c * t2 + i + 1) * r - 1)),
            pl.BlockSpec((cin_p, tm), lambda c, i: (0, c * t2 + i + 1)),
            pl.BlockSpec((cin_p, h128), lambda c, i: (0, (c * t2 + i + 2) * r)),
            pl.BlockSpec((1, h128), lambda c, i: (0, (c * t2 + i + 1) * r - 1)),
            pl.BlockSpec((1, tm), lambda c, i: (0, c * t2 + i + 1)),
            pl.BlockSpec((1, h128), lambda c, i: (0, (c * t2 + i + 2) * r)),
            pl.BlockSpec((cout_p, k_dim), lambda c, i: (0, 0)),     # packed weights
            pl.BlockSpec((cout_p, 1), lambda c, i: (0, 0)),         # bias
            pl.BlockSpec((cin_p, 1), lambda c, i: (0, 0)),          # prev-BN scale
            pl.BlockSpec((cin_p, 1), lambda c, i: (0, 0)),          # prev-BN shift
            pl.BlockSpec(memory_space=pltpu.MemorySpace.SMEM),      # PReLU alpha
        ],
        out_specs=(
            pl.BlockSpec((cout_p, tm), lambda c, i: (0, c * t2 + i + 1)),
            pl.BlockSpec((None, cout_p, 2), lambda c, i: (c, 0, 0)),
        ),
        out_shape=(
            jax.ShapeDtypeStruct((cout_p, r_total), jnp.bfloat16),
            jax.ShapeDtypeStruct((2, cout_p, 2), jnp.float32),
        ),
        scratch_shapes=[pltpu.VMEM((27 * cin_p, tm), jnp.float32)],
        compiler_params=pltpu.CompilerParams(
            dimension_semantics=("parallel", "arbitrary"),
            vmem_limit_bytes=32 * 1024 * 1024,
        ),
    )(x_slab, x_slab, x_slab, mask, mask, mask,
      w_packed, bias, prev_scale, prev_shift, alpha)
    return y, stats


# --------------------------------- JAX glue -------------------------------- #

def _pack_weights(w, cin_p, cout_p):
    """(3,3,3,cin,cout) -> (cout_p, 27*cin_p) bf16, K ordered (kd, kh, kw, c)."""
    _, _, _, cin, cout = w.shape
    w = jnp.pad(w, ((0, 0), (0, 0), (0, 0), (0, cin_p - cin), (0, cout_p - cout)))
    return w.reshape(27 * cin_p, cout_p).T.astype(jnp.bfloat16)


def _pad_channels(v, n, value=0.0):
    v = v.reshape(-1)
    return jnp.pad(v, (0, n - v.shape[0]), constant_values=value)


def _bn_scale_shift(stats, count, gamma, beta, eps):
    """BatchNorm (training mode, biased variance) as y*scale + shift per channel."""
    s = stats.sum(axis=0)                      # reduce the 2 per-core partials
    mean = s[:, 0] / count
    var = jnp.maximum(s[:, 1] / count - mean * mean, 0.0)
    inv = jax.lax.rsqrt(var + eps)
    scale = gamma * inv
    shift = beta - mean * scale
    return scale, shift


@jax.jit
def conv_block_forward(x_ncdhw, p, eps=1e-5):
    N, Cin, D, H, W = x_ncdhw.shape
    Cout = p["w1"].shape[-1]
    Dp, Hp, Wp = D + 2, H + 2, W + 2
    P = Dp * Hp * Wp
    Mp = N * P
    count = float(N * D * H * W)

    cin_p = _round_up(Cin, 8)
    cout_p = _round_up(Cout, 8)
    off_max = Hp * Wp + Wp + 1                 # largest |tap offset| in rows
    h128 = _round_up(off_max, 128)             # halo block width (lane tiles)

    # Tile size: large, multiple of the halo width, clamped by problem size and
    # by a VMEM heuristic for the (27*C, tm) LHS scratch.
    tm_cap = max(h128,
                 (VMEM_BUDGET // (27 * max(cin_p, cout_p) * 6)) // h128 * h128)
    tm = min(_round_up(TM_TARGET, h128), _round_up(_cdiv(Mp, 2), h128), tm_cap)
    tm = max(tm, h128)
    mp_pad = _round_up(Mp, 2 * tm)
    n_tiles = mp_pad // tm
    R = mp_pad + 2 * tm

    # Channels-first slab (cin_p, R): flattened (n, d, h, w) of the padded grid
    # on the lane axis; channel dim padded to a multiple of 8 so all in-kernel
    # slices/stores are sublane-aligned.  Guard columns (tm each side) are zero.
    xt = jnp.transpose(x_ncdhw, (1, 0, 2, 3, 4))                 # (Cin, N, D, H, W)
    xp = jnp.pad(xt, ((0, cin_p - Cin), (0, 0), (1, 1), (1, 1), (1, 1)))
    slab1 = jnp.pad(xp.reshape(cin_p, Mp).astype(jnp.bfloat16),
                    ((0, 0), (tm, R - tm - Mp)))

    # Interior mask (bf16) over the padded grid, shared by both stages; guard /
    # tail columns are 0 so uninitialized guard HBM can never leak in.
    interior = jnp.zeros((N, Dp, Hp, Wp), jnp.float32)
    interior = interior.at[:, 1:-1, 1:-1, 1:-1].set(1.0)
    mask = jnp.pad(interior.reshape(1, Mp).astype(jnp.bfloat16),
                   ((0, 0), (tm, R - tm - Mp)))

    w1 = _pack_weights(p["w1"], cin_p, cout_p)
    w2 = _pack_weights(p["w2"], cout_p, cout_p)
    b1 = _pad_channels(p["b1"], cout_p).reshape(cout_p, 1)
    b2 = _pad_channels(p["b2"], cout_p).reshape(cout_p, 1)
    ident_scale = jnp.ones((cin_p, 1), jnp.float32)
    ident_shift = jnp.zeros((cin_p, 1), jnp.float32)

    # Stage 1: conv + PReLU + batch stats (BN1 applied later, folded into the
    # stage-2 input path).
    y1, st1 = conv_prelu_stats(slab1, mask, w1, b1, ident_scale, ident_shift,
                               p["alpha1"], tm=tm, n_tiles=n_tiles,
                               hp=Hp, wp=Wp, h128=h128)
    scale1, shift1 = _bn_scale_shift(st1, count,
                                     _pad_channels(p["gamma1"], cout_p, 1.0),
                                     _pad_channels(p["beta1"], cout_p, 0.0), eps)

    # Stage 2: BN1 affine + re-zeroing of padded columns fused into the conv
    # input path.
    y2, st2 = conv_prelu_stats(y1, mask, w2, b2,
                               scale1.reshape(cout_p, 1), shift1.reshape(cout_p, 1),
                               p["alpha2"], tm=tm, n_tiles=n_tiles,
                               hp=Hp, wp=Wp, h128=h128)
    scale2, shift2 = _bn_scale_shift(st2, count,
                                     _pad_channels(p["gamma2"], cout_p, 1.0),
                                     _pad_channels(p["beta2"], cout_p, 0.0), eps)

    # Final BatchNorm folded into the output gather / transpose (fused by XLA).
    out = y2[:, tm:tm + Mp].astype(jnp.float32)
    out = out * scale2[:, None] + shift2[:, None]
    out = out.reshape(cout_p, N, Dp, Hp, Wp)[:, :, 1:-1, 1:-1, 1:-1]
    return jnp.transpose(out, (1, 0, 2, 3, 4))[:, :Cout]          # back to NCDHW


def init_params(key, in_ch, out_ch):
    k1, k2, k3, k4 = jax.random.split(key, 4)
    fan1 = float(in_ch * 27)
    fan2 = float(out_ch * 27)
    return dict(
        w1=jax.random.uniform(k1, (3, 3, 3, in_ch, out_ch), jnp.float32, -1.0, 1.0)
           / jnp.sqrt(fan1),
        b1=jax.random.uniform(k2, (1, out_ch), jnp.float32, -1.0, 1.0) / jnp.sqrt(fan1),
        alpha1=jnp.full((1, 1), 0.25, jnp.float32),     # nn.PReLU() default (1 param)
        gamma1=jnp.ones((out_ch,), jnp.float32),        # BatchNorm3d default affine
        beta1=jnp.zeros((out_ch,), jnp.float32),
        w2=jax.random.uniform(k3, (3, 3, 3, out_ch, out_ch), jnp.float32, -1.0, 1.0)
           / jnp.sqrt(fan2),
        b2=jax.random.uniform(k4, (1, out_ch), jnp.float32, -1.0, 1.0) / jnp.sqrt(fan2),
        alpha2=jnp.full((1, 1), 0.25, jnp.float32),
        gamma2=jnp.ones((out_ch,), jnp.float32),
        beta2=jnp.zeros((out_ch,), jnp.float32),
    )


def _reference_forward(x, p, eps=1e-5):
    """Pure-JAX f32 reference of the PyTorch ConvBlock forward (training-mode BN)."""
    def stage(x, w, b, alpha, gamma, beta):
        y = jax.lax.conv_general_dilated(
            x, w, window_strides=(1, 1, 1), padding=((1, 1),) * 3,
            dimension_numbers=("NCDHW", "DHWIO", "NCDHW"))
        y = y + b.reshape(1, -1, 1, 1, 1)
        y = jnp.where(y > 0, y, alpha.reshape(()) * y)
        mean = jnp.mean(y, axis=(0, 2, 3, 4), keepdims=True)
        var = jnp.mean((y - mean) ** 2, axis=(0, 2, 3, 4), keepdims=True)
        y = (y - mean) * jax.lax.rsqrt(var + eps)
        return y * gamma.reshape(1, -1, 1, 1, 1) + beta.reshape(1, -1, 1, 1, 1)

    y = stage(x, p["w1"], p["b1"], p["alpha1"], p["gamma1"], p["beta1"])
    return stage(y, p["w2"], p["b2"], p["alpha2"], p["gamma2"], p["beta2"])


if __name__ == "__main__":
    key = jax.random.PRNGKey(0)
    kx, kp = jax.random.split(key)

    N, Cin, Cout, D, H, W = 2, 4, 8, 8, 8, 8
    x = jax.random.normal(kx, (N, Cin, D, H, W), jnp.float32)   # NCDHW like PyTorch
    params = init_params(kp, Cin, Cout)

    out = jax.block_until_ready(conv_block_forward(x, params))
    assert out.shape == (N, Cout, D, H, W), out.shape
    assert bool(jnp.all(jnp.isfinite(out)))

    ref = _reference_forward(x, params)
    err = float(jnp.max(jnp.abs(out - ref)))
    assert err < 0.3, f"max abs error vs f32 reference too large: {err}"
    print("KERNEL_OK")
</pallas_src>

<mosaic_0001>
module attributes {stable_mosaic.version = 11 : i64} {
  func.func @kernel(%arg0: i32, %arg1: i32, %arg2: memref<8x128xbf16, #tpu.memory_space<vmem>>, %arg3: memref<8x1024xbf16, #tpu.memory_space<vmem>>, %arg4: memref<8x128xbf16, #tpu.memory_space<vmem>>, %arg5: memref<1x128xbf16, #tpu.memory_space<vmem>>, %arg6: memref<1x1024xbf16, #tpu.memory_space<vmem>>, %arg7: memref<1x128xbf16, #tpu.memory_space<vmem>>, %arg8: memref<8x216xbf16, #tpu.memory_space<vmem>>, %arg9: memref<8x1xf32, #tpu.memory_space<vmem>>, %arg10: memref<8x1xf32, #tpu.memory_space<vmem>>, %arg11: memref<8x1xf32, #tpu.memory_space<vmem>>, %arg12: memref<1x1xf32, #tpu.memory_space<smem>>, %arg13: memref<8x1024xbf16, #tpu.memory_space<vmem>>, %arg14: memref<1x8x2xf32, #tpu.memory_space<vmem>>, %arg15: memref<216x1024xf32, #tpu.memory_space<vmem>>) attributes {dimension_semantics = [#tpu.dimension_semantics<parallel>, #tpu.dimension_semantics<arbitrary>], iteration_bounds = array<i64: 2, 1>, scalar_prefetch = 0 : i64, scratch_operands = 1 : i64, tpu.core_type = #tpu.core_type<tc>, window_params = [{transform_indices = @transform_0, window_bounds = array<i64: 8, 128>}, {transform_indices = @transform_1, window_bounds = array<i64: 8, 1024>}, {transform_indices = @transform_2, window_bounds = array<i64: 8, 128>}, {transform_indices = @transform_3, window_bounds = array<i64: 1, 128>}, {transform_indices = @transform_4, window_bounds = array<i64: 1, 1024>}, {transform_indices = @transform_5, window_bounds = array<i64: 1, 128>}, {pipeline_mode = #tpu.pipeline_mode<synchronous>, transform_indices = @transform_6, window_bounds = array<i64: 8, 216>}, {pipeline_mode = #tpu.pipeline_mode<synchronous>, transform_indices = @transform_7, window_bounds = array<i64: 8, 1>}, {pipeline_mode = #tpu.pipeline_mode<synchronous>, transform_indices = @transform_8, window_bounds = array<i64: 8, 1>}, {pipeline_mode = #tpu.pipeline_mode<synchronous>, transform_indices = @transform_9, window_bounds = array<i64: 8, 1>}, {transform_indices = @transform_10, window_bounds = array<i64: 1, 1>}, {transform_indices = @transform_11, window_bounds = array<i64: 8, 1024>}, {transform_indices = @transform_12, window_bounds = array<i64: 1, 8, 2>}]} {
    %c0_i32 = arith.constant 0 : i32
    %0 = arith.cmpi eq, %arg1, %c0_i32 : i32
    %1 = arith.extui %0 : i1 to i32
    %c0_i32_0 = arith.constant 0 : i32
    %2 = arith.cmpi ne, %1, %c0_i32_0 : i32
    scf.if %2 {
      %cst_74 = arith.constant 0.000000e+00 : f32
      %117 = vector.broadcast %cst_74 : f32 to vector<8x2xf32>
      %c0_75 = arith.constant 0 : index
      %c0_76 = arith.constant 0 : index
      %c0_77 = arith.constant 0 : index
      %118 = vector.load %arg14[%c0_75, %c0_76, %c0_77] : memref<1x8x2xf32, #tpu.memory_space<vmem>>, vector<1x8x2xf32>
      %119 = vector.shape_cast %118 : vector<1x8x2xf32> to vector<8x2xf32>
      %120 = vector.shape_cast %117 : vector<8x2xf32> to vector<1x8x2xf32>
      tpu.vector_store %arg14[%c0_75, %c0_76, %c0_77], %120 {strides = array<i32>} : memref<1x8x2xf32, #tpu.memory_space<vmem>>, vector<1x8x2xf32>,
    } else {
    }
    %c0 = arith.constant 0 : index
    %c0_1 = arith.constant 0 : index
    %3 = vector.load %arg2[%c0, %c0_1] : memref<8x128xbf16, #tpu.memory_space<vmem>>, vector<8x128xbf16>
    %c0_2 = arith.constant 0 : index
    %c0_3 = arith.constant 0 : index
    %4 = vector.load %arg3[%c0_2, %c0_3] : memref<8x1024xbf16, #tpu.memory_space<vmem>>, vector<8x1024xbf16>
    %c0_4 = arith.constant 0 : index
    %c0_5 = arith.constant 0 : index
    %5 = vector.load %arg4[%c0_4, %c0_5] : memref<8x128xbf16, #tpu.memory_space<vmem>>, vector<8x128xbf16>
    %6 = tpu.concatenate %3, %4, %5 in 1 : vector<8x128xbf16>, vector<8x1024xbf16>, vector<8x128xbf16> -> vector<8x1280xbf16>
    %7 = arith.extf %6 : vector<8x1280xbf16> to vector<8x1280xf32>
    %c0_6 = arith.constant 0 : index
    %c0_7 = arith.constant 0 : index
    %8 = vector.load %arg5[%c0_6, %c0_7] : memref<1x128xbf16, #tpu.memory_space<vmem>>, vector<1x128xbf16>
    %c0_8 = arith.constant 0 : index
    %c0_9 = arith.constant 0 : index
    %9 = vector.load %arg6[%c0_8, %c0_9] : memref<1x1024xbf16, #tpu.memory_space<vmem>>, vector<1x1024xbf16>
    %c0_10 = arith.constant 0 : index
    %c0_11 = arith.constant 0 : index
    %10 = vector.load %arg7[%c0_10, %c0_11] : memref<1x128xbf16, #tpu.memory_space<vmem>>, vector<1x128xbf16>
    %11 = tpu.concatenate %8, %9, %10 in 1 : vector<1x128xbf16>, vector<1x1024xbf16>, vector<1x128xbf16> -> vector<1x1280xbf16>
    %cst = arith.constant 0.000000e+00 : bf16
    %12 = vector.broadcast %cst : bf16 to vector<1x1280xbf16>
    %13 = arith.cmpf ogt, %11, %12 : vector<1x1280xbf16>
    %c0_12 = arith.constant 0 : index
    %c0_13 = arith.constant 0 : index
    %14 = vector.load %arg10[%c0_12, %c0_13] : memref<8x1xf32, #tpu.memory_space<vmem>>, vector<8x1xf32>
    %15 = vector.broadcast %14 : vector<8x1xf32> to vector<8x1280xf32>
    %16 = arith.mulf %7, %15 : vector<8x1280xf32>
    %c0_14 = arith.constant 0 : index
    %c0_15 = arith.constant 0 : index
    %17 = vector.load %arg11[%c0_14, %c0_15] : memref<8x1xf32, #tpu.memory_space<vmem>>, vector<8x1xf32>
    %18 = vector.broadcast %17 : vector<8x1xf32> to vector<8x1280xf32>
    %19 = arith.addf %16, %18 : vector<8x1280xf32>
    %cst_16 = arith.constant 0.000000e+00 : f32
    %20 = vector.shape_cast %13 : vector<1x1280xi1> to vector<1x1280xi1>
    %21 = vector.broadcast %20 : vector<1x1280xi1> to vector<8x1280xi1>
    %22 = vector.broadcast %cst_16 : f32 to vector<8x1280xf32>
    %23 = arith.select %21, %19, %22 : vector<8x1280xi1>, vector<8x1280xf32>
    %24 = vector.extract_strided_slice %23 {offsets = [0, 17], sizes = [8, 1024], strides = [1, 1]} : vector<8x1280xf32> to vector<8x1024xf32>
    %c0_17 = arith.constant 0 : index
    %c0_18 = arith.constant 0 : index
    %25 = vector.load %arg15[%c0_17, %c0_18] : memref<216x1024xf32, #tpu.memory_space<vmem>>, vector<8x1024xf32>
    tpu.vector_store %arg15[%c0_17, %c0_18], %24 {strides = array<i32>} : memref<216x1024xf32, #tpu.memory_space<vmem>>, vector<8x1024xf32>,
    %26 = vector.extract_strided_slice %23 {offsets = [0, 18], sizes = [8, 1024], strides = [1, 1]} : vector<8x1280xf32> to vector<8x1024xf32>
    %c8 = arith.constant 8 : index
    %c0_19 = arith.constant 0 : index
    %27 = vector.load %arg15[%c8, %c0_19] : memref<216x1024xf32, #tpu.memory_space<vmem>>, vector<8x1024xf32>
    tpu.vector_store %arg15[%c8, %c0_19], %26 {strides = array<i32>} : memref<216x1024xf32, #tpu.memory_space<vmem>>, vector<8x1024xf32>,
    %28 = vector.extract_strided_slice %23 {offsets = [0, 19], sizes = [8, 1024], strides = [1, 1]} : vector<8x1280xf32> to vector<8x1024xf32>
    %c16 = arith.constant 16 : index
    %c0_20 = arith.constant 0 : index
    %29 = vector.load %arg15[%c16, %c0_20] : memref<216x1024xf32, #tpu.memory_space<vmem>>, vector<8x1024xf32>
    tpu.vector_store %arg15[%c16, %c0_20], %28 {strides = array<i32>} : memref<216x1024xf32, #tpu.memory_space<vmem>>, vector<8x1024xf32>,
    %30 = vector.extract_strided_slice %23 {offsets = [0, 27], sizes = [8, 1024], strides = [1, 1]} : vector<8x1280xf32> to vector<8x1024xf32>
    %c24 = arith.constant 24 : index
    %c0_21 = arith.constant 0 : index
    %31 = vector.load %arg15[%c24, %c0_21] : memref<216x1024xf32, #tpu.memory_space<vmem>>, vector<8x1024xf32>
    tpu.vector_store %arg15[%c24, %c0_21], %30 {strides = array<i32>} : memref<216x1024xf32, #tpu.memory_space<vmem>>, vector<8x1024xf32>,
    %32 = vector.extract_strided_slice %23 {offsets = [0, 28], sizes = [8, 1024], strides = [1, 1]} : vector<8x1280xf32> to vector<8x1024xf32>
    %c32 = arith.constant 32 : index
    %c0_22 = arith.constant 0 : index
    %33 = vector.load %arg15[%c32, %c0_22] : memref<216x1024xf32, #tpu.memory_space<vmem>>, vector<8x1024xf32>
    tpu.vector_store %arg15[%c32, %c0_22], %32 {strides = array<i32>} : memref<216x1024xf32, #tpu.memory_space<vmem>>, vector<8x1024xf32>,
    %34 = vector.extract_strided_slice %23 {offsets = [0, 29], sizes = [8, 1024], strides = [1, 1]} : vector<8x1280xf32> to vector<8x1024xf32>
    %c40 = arith.constant 40 : index
    %c0_23 = arith.constant 0 : index
    %35 = vector.load %arg15[%c40, %c0_23] : memref<216x1024xf32, #tpu.memory_space<vmem>>, vector<8x1024xf32>
    tpu.vector_store %arg15[%c40, %c0_23], %34 {strides = array<i32>} : memref<216x1024xf32, #tpu.memory_space<vmem>>, vector<8x1024xf32>,
    %36 = vector.extract_strided_slice %23 {offsets = [0, 37], sizes = [8, 1024], strides = [1, 1]} : vector<8x1280xf32> to vector<8x1024xf32>
    %c48 = arith.constant 48 : index
    %c0_24 = arith.constant 0 : index
    %37 = vector.load %arg15[%c48, %c0_24] : memref<216x1024xf32, #tpu.memory_space<vmem>>, vector<8x1024xf32>
    tpu.vector_store %arg15[%c48, %c0_24], %36 {strides = array<i32>} : memref<216x1024xf32, #tpu.memory_space<vmem>>, vector<8x1024xf32>,
    %38 = vector.extract_strided_slice %23 {offsets = [0, 38], sizes = [8, 1024], strides = [1, 1]} : vector<8x1280xf32> to vector<8x1024xf32>
    %c56 = arith.constant 56 : index
    %c0_25 = arith.constant 0 : index
    %39 = vector.load %arg15[%c56, %c0_25] : memref<216x1024xf32, #tpu.memory_space<vmem>>, vector<8x1024xf32>
    tpu.vector_store %arg15[%c56, %c0_25], %38 {strides = array<i32>} : memref<216x1024xf32, #tpu.memory_space<vmem>>, vector<8x1024xf32>,
    %40 = vector.extract_strided_slice %23 {offsets = [0, 39], sizes = [8, 1024], strides = [1, 1]} : vector<8x1280xf32> to vector<8x1024xf32>
    %c64 = arith.constant 64 : index
    %c0_26 = arith.constant 0 : index
    %41 = vector.load %arg15[%c64, %c0_26] : memref<216x1024xf32, #tpu.memory_space<vmem>>, vector<8x1024xf32>
    tpu.vector_store %arg15[%c64, %c0_26], %40 {strides = array<i32>} : memref<216x1024xf32, #tpu.memory_space<vmem>>, vector<8x1024xf32>,
    %42 = vector.extract_strided_slice %23 {offsets = [0, 117], sizes = [8, 1024], strides = [1, 1]} : vector<8x1280xf32> to vector<8x1024xf32>
    %c72 = arith.constant 72 : index
    %c0_27 = arith.constant 0 : index
    %43 = vector.load %arg15[%c72, %c0_27] : memref<216x1024xf32, #tpu.memory_space<vmem>>, vector<8x1024xf32>
    tpu.vector_store %arg15[%c72, %c0_27], %42 {strides = array<i32>} : memref<216x1024xf32, #tpu.memory_space<vmem>>, vector<8x1024xf32>,
    %44 = vector.extract_strided_slice %23 {offsets = [0, 118], sizes = [8, 1024], strides = [1, 1]} : vector<8x1280xf32> to vector<8x1024xf32>
    %c80 = arith.constant 80 : index
    %c0_28 = arith.constant 0 : index
    %45 = vector.load %arg15[%c80, %c0_28] : memref<216x1024xf32, #tpu.memory_space<vmem>>, vector<8x1024xf32>
    tpu.vector_store %arg15[%c80, %c0_28], %44 {strides = array<i32>} : memref<216x1024xf32, #tpu.memory_space<vmem>>, vector<8x1024xf32>,
    %46 = vector.extract_strided_slice %23 {offsets = [0, 119], sizes = [8, 1024], strides = [1, 1]} : vector<8x1280xf32> to vector<8x1024xf32>
    %c88 = arith.constant 88 : index
    %c0_29 = arith.constant 0 : index
    %47 = vector.load %arg15[%c88, %c0_29] : memref<216x1024xf32, #tpu.memory_space<vmem>>, vector<8x1024xf32>
    tpu.vector_store %arg15[%c88, %c0_29], %46 {strides = array<i32>} : memref<216x1024xf32, #tpu.memory_space<vmem>>, vector<8x1024xf32>,
    %48 = vector.extract_strided_slice %23 {offsets = [0, 127], sizes = [8, 1024], strides = [1, 1]} : vector<8x1280xf32> to vector<8x1024xf32>
    %c96 = arith.constant 96 : index
    %c0_30 = arith.constant 0 : index
    %49 = vector.load %arg15[%c96, %c0_30] : memref<216x1024xf32, #tpu.memory_space<vmem>>, vector<8x1024xf32>
    tpu.vector_store %arg15[%c96, %c0_30], %48 {strides = array<i32>} : memref<216x1024xf32, #tpu.memory_space<vmem>>, vector<8x1024xf32>,
    %50 = vector.extract_strided_slice %23 {offsets = [0, 128], sizes = [8, 1024], strides = [1, 1]} : vector<8x1280xf32> to vector<8x1024xf32>
    %c104 = arith.constant 104 : index
    %c0_31 = arith.constant 0 : index
    %51 = vector.load %arg15[%c104, %c0_31] : memref<216x1024xf32, #tpu.memory_space<vmem>>, vector<8x1024xf32>
    tpu.vector_store %arg15[%c104, %c0_31], %50 {strides = array<i32>} : memref<216x1024xf32, #tpu.memory_space<vmem>>, vector<8x1024xf32>,
    %52 = vector.extract_strided_slice %23 {offsets = [0, 129], sizes = [8, 1024], strides = [1, 1]} : vector<8x1280xf32> to vector<8x1024xf32>
    %c112 = arith.constant 112 : index
    %c0_32 = arith.constant 0 : index
    %53 = vector.load %arg15[%c112, %c0_32] : memref<216x1024xf32, #tpu.memory_space<vmem>>, vector<8x1024xf32>
    tpu.vector_store %arg15[%c112, %c0_32], %52 {strides = array<i32>} : memref<216x1024xf32, #tpu.memory_space<vmem>>, vector<8x1024xf32>,
    %54 = vector.extract_strided_slice %23 {offsets = [0, 137], sizes = [8, 1024], strides = [1, 1]} : vector<8x1280xf32> to vector<8x1024xf32>
    %c120 = arith.constant 120 : index
    %c0_33 = arith.constant 0 : index
    %55 = vector.load %arg15[%c120, %c0_33] : memref<216x1024xf32, #tpu.memory_space<vmem>>, vector<8x1024xf32>
    tpu.vector_store %arg15[%c120, %c0_33], %54 {strides = array<i32>} : memref<216x1024xf32, #tpu.memory_space<vmem>>, vector<8x1024xf32>,
    %56 = vector.extract_strided_slice %23 {offsets = [0, 138], sizes = [8, 1024], strides = [1, 1]} : vector<8x1280xf32> to vector<8x1024xf32>
    %c128 = arith.constant 128 : index
    %c0_34 = arith.constant 0 : index
    %57 = vector.load %arg15[%c128, %c0_34] : memref<216x1024xf32, #tpu.memory_space<vmem>>, vector<8x1024xf32>
    tpu.vector_store %arg15[%c128, %c0_34], %56 {strides = array<i32>} : memref<216x1024xf32, #tpu.memory_space<vmem>>, vector<8x1024xf32>,
    %58 = vector.extract_strided_slice %23 {offsets = [0, 139], sizes = [8, 1024], strides = [1, 1]} : vector<8x1280xf32> to vector<8x1024xf32>
    %c136 = arith.constant 136 : index
    %c0_35 = arith.constant 0 : index
    %59 = vector.load %arg15[%c136, %c0_35] : memref<216x1024xf32, #tpu.memory_space<vmem>>, vector<8x1024xf32>
    tpu.vector_store %arg15[%c136, %c0_35], %58 {strides = array<i32>} : memref<216x1024xf32, #tpu.memory_space<vmem>>, vector<8x1024xf32>,
    %60 = vector.extract_strided_slice %23 {offsets = [0, 217], sizes = [8, 1024], strides = [1, 1]} : vector<8x1280xf32> to vector<8x1024xf32>
    %c144 = arith.constant 144 : index
    %c0_36 = arith.constant 0 : index
    %61 = vector.load %arg15[%c144, %c0_36] : memref<216x1024xf32, #tpu.memory_space<vmem>>, vector<8x1024xf32>
    tpu.vector_store %arg15[%c144, %c0_36], %60 {strides = array<i32>} : memref<216x1024xf32, #tpu.memory_space<vmem>>, vector<8x1024xf32>,
    %62 = vector.extract_strided_slice %23 {offsets = [0, 218], sizes = [8, 1024], strides = [1, 1]} : vector<8x1280xf32> to vector<8x1024xf32>
    %c152 = arith.constant 152 : index
    %c0_37 = arith.constant 0 : index
    %63 = vector.load %arg15[%c152, %c0_37] : memref<216x1024xf32, #tpu.memory_space<vmem>>, vector<8x1024xf32>
    tpu.vector_store %arg15[%c152, %c0_37], %62 {strides = array<i32>} : memref<216x1024xf32, #tpu.memory_space<vmem>>, vector<8x1024xf32>,
    %64 = vector.extract_strided_slice %23 {offsets = [0, 219], sizes = [8, 1024], strides = [1, 1]} : vector<8x1280xf32> to vector<8x1024xf32>
    %c160 = arith.constant 160 : index
    %c0_38 = arith.constant 0 : index
    %65 = vector.load %arg15[%c160, %c0_38] : memref<216x1024xf32, #tpu.memory_space<vmem>>, vector<8x1024xf32>
    tpu.vector_store %arg15[%c160, %c0_38], %64 {strides = array<i32>} : memref<216x1024xf32, #tpu.memory_space<vmem>>, vector<8x1024xf32>,
    %66 = vector.extract_strided_slice %23 {offsets = [0, 227], sizes = [8, 1024], strides = [1, 1]} : vector<8x1280xf32> to vector<8x1024xf32>
    %c168 = arith.constant 168 : index
    %c0_39 = arith.constant 0 : index
    %67 = vector.load %arg15[%c168, %c0_39] : memref<216x1024xf32, #tpu.memory_space<vmem>>, vector<8x1024xf32>
    tpu.vector_store %arg15[%c168, %c0_39], %66 {strides = array<i32>} : memref<216x1024xf32, #tpu.memory_space<vmem>>, vector<8x1024xf32>,
    %68 = vector.extract_strided_slice %23 {offsets = [0, 228], sizes = [8, 1024], strides = [1, 1]} : vector<8x1280xf32> to vector<8x1024xf32>
    %c176 = arith.constant 176 : index
    %c0_40 = arith.constant 0 : index
    %69 = vector.load %arg15[%c176, %c0_40] : memref<216x1024xf32, #tpu.memory_space<vmem>>, vector<8x1024xf32>
    tpu.vector_store %arg15[%c176, %c0_40], %68 {strides = array<i32>} : memref<216x1024xf32, #tpu.memory_space<vmem>>, vector<8x1024xf32>,
    %70 = vector.extract_strided_slice %23 {offsets = [0, 229], sizes = [8, 1024], strides = [1, 1]} : vector<8x1280xf32> to vector<8x1024xf32>
    %c184 = arith.constant 184 : index
    %c0_41 = arith.constant 0 : index
    %71 = vector.load %arg15[%c184, %c0_41] : memref<216x1024xf32, #tpu.memory_space<vmem>>, vector<8x1024xf32>
    tpu.vector_store %arg15[%c184, %c0_41], %70 {strides = array<i32>} : memref<216x1024xf32, #tpu.memory_space<vmem>>, vector<8x1024xf32>,
    %72 = vector.extract_strided_slice %23 {offsets = [0, 237], sizes = [8, 1024], strides = [1, 1]} : vector<8x1280xf32> to vector<8x1024xf32>
    %c192 = arith.constant 192 : index
    %c0_42 = arith.constant 0 : index
    %73 = vector.load %arg15[%c192, %c0_42] : memref<216x1024xf32, #tpu.memory_space<vmem>>, vector<8x1024xf32>
    tpu.vector_store %arg15[%c192, %c0_42], %72 {strides = array<i32>} : memref<216x1024xf32, #tpu.memory_space<vmem>>, vector<8x1024xf32>,
    %74 = vector.extract_strided_slice %23 {offsets = [0, 238], sizes = [8, 1024], strides = [1, 1]} : vector<8x1280xf32> to vector<8x1024xf32>
    %c200 = arith.constant 200 : index
    %c0_43 = arith.constant 0 : index
    %75 = vector.load %arg15[%c200, %c0_43] : memref<216x1024xf32, #tpu.memory_space<vmem>>, vector<8x1024xf32>
    tpu.vector_store %arg15[%c200, %c0_43], %74 {strides = array<i32>} : memref<216x1024xf32, #tpu.memory_space<vmem>>, vector<8x1024xf32>,
    %76 = vector.extract_strided_slice %23 {offsets = [0, 239], sizes = [8, 1024], strides = [1, 1]} : vector<8x1280xf32> to vector<8x1024xf32>
    %c208 = arith.constant 208 : index
    %c0_44 = arith.constant 0 : index
    %77 = vector.load %arg15[%c208, %c0_44] : memref<216x1024xf32, #tpu.memory_space<vmem>>, vector<8x1024xf32>
    tpu.vector_store %arg15[%c208, %c0_44], %76 {strides = array<i32>} : memref<216x1024xf32, #tpu.memory_space<vmem>>, vector<8x1024xf32>,
    %c0_45 = arith.constant 0 : index
    %c0_46 = arith.constant 0 : index
    %78 = vector.load %arg8[%c0_45, %c0_46] : memref<8x216xbf16, #tpu.memory_space<vmem>>, vector<8x216xbf16>
    %c0_47 = arith.constant 0 : index
    %c0_48 = arith.constant 0 : index
    %79 = vector.load %arg15[%c0_47, %c0_48] : memref<216x1024xf32, #tpu.memory_space<vmem>>, vector<216x1024xf32>
    %80 = arith.truncf %79 : vector<216x1024xf32> to vector<216x1024xbf16>
    %cst_49 = arith.constant dense<0.000000e+00> : vector<8x1024xf32>
    %81 = tpu.matmul %78, %80, %cst_49 {dimension_numbers = #tpu.dot_dimension_numbers<[1], [0], [0], [1], [0, 0, 1, 1], [], []>} : vector<8x216xbf16>, vector<216x1024xbf16>, vector<8x1024xf32> -> vector<8x1024xf32>
    %c0_50 = arith.constant 0 : index
    %c0_51 = arith.constant 0 : index
    %82 = vector.load %arg9[%c0_50, %c0_51] : memref<8x1xf32, #tpu.memory_space<vmem>>, vector<8x1xf32>
    %83 = vector.broadcast %82 : vector<8x1xf32> to vector<8x1024xf32>
    %84 = arith.addf %81, %83 : vector<8x1024xf32>
    %c0_52 = arith.constant 0 : index
    %c0_53 = arith.constant 0 : index
    %85 = memref.load %arg12[%c0_52, %c0_53] : memref<1x1xf32, #tpu.memory_space<smem>>
    %cst_54 = arith.constant 0.000000e+00 : f32
    %86 = vector.broadcast %cst_54 : f32 to vector<8x1024xf32>
    %87 = arith.cmpf ogt, %84, %86 : vector<8x1024xf32>
    %88 = vector.broadcast %85 : f32 to vector<8x1024xf32>
    %89 = arith.mulf %88, %84 : vector<8x1024xf32>
    %90 = arith.select %87, %84, %89 : vector<8x1024xi1>, vector<8x1024xf32>
    %c0_55 = arith.constant 0 : index
    %c0_56 = arith.constant 0 : index
    %91 = vector.load %arg6[%c0_55, %c0_56] : memref<1x1024xbf16, #tpu.memory_space<vmem>>, vector<1x1024xbf16>
    %cst_57 = arith.constant 0.000000e+00 : bf16
    %92 = vector.broadcast %cst_57 : bf16 to vector<1x1024xbf16>
    %93 = arith.cmpf ogt, %91, %92 : vector<1x1024xbf16>
    %cst_58 = arith.constant 0.000000e+00 : f32
    %94 = vector.shape_cast %93 : vector<1x1024xi1> to vector<1x1024xi1>
    %95 = vector.broadcast %94 : vector<1x1024xi1> to vector<8x1024xi1>
    %96 = vector.broadcast %cst_58 : f32 to vector<8x1024xf32>
    %97 = arith.select %95, %90, %96 : vector<8x1024xi1>, vector<8x1024xf32>
    %98 = arith.truncf %97 : vector<8x1024xf32> to vector<8x1024xbf16>
    %c0_59 = arith.constant 0 : index
    %c0_60 = arith.constant 0 : index
    %99 = vector.load %arg13[%c0_59, %c0_60] : memref<8x1024xbf16, #tpu.memory_space<vmem>>, vector<8x1024xbf16>
    tpu.vector_store %arg13[%c0_59, %c0_60], %98 {strides = array<i32>} : memref<8x1024xbf16, #tpu.memory_space<vmem>>, vector<8x1024xbf16>,
    %c0_61 = arith.constant 0 : index
    %c0_62 = arith.constant 0 : index
    %c0_63 = arith.constant 0 : index
    %100 = vector.load %arg14[%c0_61, %c0_62, %c0_63] : memref<1x8x2xf32, #tpu.memory_space<vmem>>, vector<1x8x1xf32>
    %101 = vector.shape_cast %100 : vector<1x8x1xf32> to vector<8x1xf32>
    %cst_64 = arith.constant dense<0.000000e+00> : vector<8xf32>
    %102 = vector.multi_reduction <add>, %97, %cst_64 [1] : vector<8x1024xf32> to vector<8xf32>
    %103 = vector.shape_cast %102 : vector<8xf32> to vector<8x1xf32>
    %104 = arith.addf %101, %103 : vector<8x1xf32>
    %c0_65 = arith.constant 0 : index
    %c0_66 = arith.constant 0 : index
    %c0_67 = arith.constant 0 : index
    %105 = vector.load %arg14[%c0_65, %c0_66, %c0_67] : memref<1x8x2xf32, #tpu.memory_space<vmem>>, vector<1x8x1xf32>
    %106 = vector.shape_cast %105 : vector<1x8x1xf32> to vector<8x1xf32>
    %107 = vector.shape_cast %104 : vector<8x1xf32> to vector<1x8x1xf32>
    tpu.vector_store %arg14[%c0_65, %c0_66, %c0_67], %107 {strides = array<i32>} : memref<1x8x2xf32, #tpu.memory_space<vmem>>, vector<1x8x1xf32>,
    %c0_68 = arith.constant 0 : index
    %c0_69 = arith.constant 0 : index
    %c1 = arith.constant 1 : index
    %108 = vector.load %arg14[%c0_68, %c0_69, %c1] : memref<1x8x2xf32, #tpu.memory_space<vmem>>, vector<1x8x1xf32>
    %109 = vector.shape_cast %108 : vector<1x8x1xf32> to vector<8x1xf32>
    %110 = arith.mulf %97, %97 : vector<8x1024xf32>
    %cst_70 = arith.constant dense<0.000000e+00> : vector<8xf32>
    %111 = vector.multi_reduction <add>, %110, %cst_70 [1] : vector<8x1024xf32> to vector<8xf32>
    %112 = vector.shape_cast %111 : vector<8xf32> to vector<8x1xf32>
    %113 = arith.addf %109, %112 : vector<8x1xf32>
    %c0_71 = arith.constant 0 : index
    %c0_72 = arith.constant 0 : index
    %c1_73 = arith.constant 1 : index
    %114 = vector.load %arg14[%c0_71, %c0_72, %c1_73] : memref<1x8x2xf32, #tpu.memory_space<vmem>>, vector<1x8x1xf32>
    %115 = vector.shape_cast %114 : vector<1x8x1xf32> to vector<8x1xf32>
    %116 = vector.shape_cast %113 : vector<8x1xf32> to vector<1x8x1xf32>
    tpu.vector_store %arg14[%c0_71, %c0_72, %c1_73], %116 {strides = array<i32>} : memref<1x8x2xf32, #tpu.memory_space<vmem>>, vector<1x8x1xf32>,
    return
  }
  func.func @transform_0(%arg0: i32, %arg1: i32) -> (i32, i32) {
    %c1_i32 = arith.constant 1 : i32
    %0 = arith.muli %arg0, %c1_i32 : i32
    %1 = arith.addi %0, %arg1 : i32
    %c1_i32_0 = arith.constant 1 : i32
    %2 = arith.addi %1, %c1_i32_0 : i32
    %c8_i32 = arith.constant 8 : i32
    %3 = arith.muli %2, %c8_i32 : i32
    %c1_i32_1 = arith.constant 1 : i32
    %4 = arith.subi %3, %c1_i32_1 : i32
    %c0_i32 = arith.constant 0 : i32
    %c0_i32_2 = arith.constant 0 : i32
    return %c0_i32, %4 : i32, i32
  }
  func.func @transform_1(%arg0: i32, %arg1: i32) -> (i32, i32) {
    %c1_i32 = arith.constant 1 : i32
    %0 = arith.muli %arg0, %c1_i32 : i32
    %1 = arith.addi %0, %arg1 : i32
    %c1_i32_0 = arith.constant 1 : i32
    %2 = arith.addi %1, %c1_i32_0 : i32
    %c0_i32 = arith.constant 0 : i32
    %c0_i32_1 = arith.constant 0 : i32
    return %c0_i32, %2 : i32, i32
  }
  func.func @transform_2(%arg0: i32, %arg1: i32) -> (i32, i32) {
    %c1_i32 = arith.constant 1 : i32
    %0 = arith.muli %arg0, %c1_i32 : i32
    %1 = arith.addi %0, %arg1 : i32
    %c2_i32 = arith.constant 2 : i32
    %2 = arith.addi %1, %c2_i32 : i32
    %c8_i32 = arith.constant 8 : i32
    %3 = arith.muli %2, %c8_i32 : i32
    %c0_i32 = arith.constant 0 : i32
    %c0_i32_0 = arith.constant 0 : i32
    return %c0_i32, %3 : i32, i32
  }
  func.func @transform_3(%arg0: i32, %arg1: i32) -> (i32, i32) {
    %c1_i32 = arith.constant 1 : i32
    %0 = arith.muli %arg0, %c1_i32 : i32
    %1 = arith.addi %0, %arg1 : i32
    %c1_i32_0 = arith.constant 1 : i32
    %2 = arith.addi %1, %c1_i32_0 : i32
    %c8_i32 = arith.constant 8 : i32
    %3 = arith.muli %2, %c8_i32 : i32
    %c1_i32_1 = arith.constant 1 : i32
    %4 = arith.subi %3, %c1_i32_1 : i32
    %c0_i32 = arith.constant 0 : i32
    %c0_i32_2 = arith.constant 0 : i32
    return %c0_i32, %4 : i32, i32
  }
  func.func @transform_4(%arg0: i32, %arg1: i32) -> (i32, i32) {
    %c1_i32 = arith.constant 1 : i32
    %0 = arith.muli %arg0, %c1_i32 : i32
    %1 = arith.addi %0, %arg1 : i32
    %c1_i32_0 = arith.constant 1 : i32
    %2 = arith.addi %1, %c1_i32_0 : i32
    %c0_i32 = arith.constant 0 : i32
    %c0_i32_1 = arith.constant 0 : i32
    return %c0_i32, %2 : i32, i32
  }
  func.func @transform_5(%arg0: i32, %arg1: i32) -> (i32, i32) {
    %c1_i32 = arith.constant 1 : i32
    %0 = arith.muli %arg0, %c1_i32 : i32
    %1 = arith.addi %0, %arg1 : i32
    %c2_i32 = arith.constant 2 : i32
    %2 = arith.addi %1, %c2_i32 : i32
    %c8_i32 = arith.constant 8 : i32
    %3 = arith.muli %2, %c8_i32 : i32
    %c0_i32 = arith.constant 0 : i32
    %c0_i32_0 = arith.constant 0 : i32
    return %c0_i32, %3 : i32, i32
  }
  func.func @transform_6(%arg0: i32, %arg1: i32) -> (i32, i32) {
    %c0_i32 = arith.constant 0 : i32
    %c0_i32_0 = arith.constant 0 : i32
    %c0_i32_1 = arith.constant 0 : i32
    return %c0_i32, %c0_i32_0 : i32, i32
  }
  func.func @transform_7(%arg0: i32, %arg1: i32) -> (i32, i32) {
    %c0_i32 = arith.constant 0 : i32
    %c0_i32_0 = arith.constant 0 : i32
    %c0_i32_1 = arith.constant 0 : i32
    return %c0_i32, %c0_i32_0 : i32, i32
  }
  func.func @transform_8(%arg0: i32, %arg1: i32) -> (i32, i32) {
    %c0_i32 = arith.constant 0 : i32
    %c0_i32_0 = arith.constant 0 : i32
    %c0_i32_1 = arith.constant 0 : i32
    return %c0_i32, %c0_i32_0 : i32, i32
  }
  func.func @transform_9(%arg0: i32, %arg1: i32) -> (i32, i32) {
    %c0_i32 = arith.constant 0 : i32
    %c0_i32_0 = arith.constant 0 : i32
    %c0_i32_1 = arith.constant 0 : i32
    return %c0_i32, %c0_i32_0 : i32, i32
  }
  func.func @transform_10(%arg0: i32, %arg1: i32) -> (i32, i32) {
    %c0_i32 = arith.constant 0 : i32
    %c0_i32_0 = arith.constant 0 : i32
    %c0_i32_1 = arith.constant 0 : i32
    return %c0_i32, %c0_i32_0 : i32, i32
  }
  func.func @transform_11(%arg0: i32, %arg1: i32) -> (i32, i32) {
    %c1_i32 = arith.constant 1 : i32
    %0 = arith.muli %arg0, %c1_i32 : i32
    %1 = arith.addi %0, %arg1 : i32
    %c1_i32_0 = arith.constant 1 : i32
    %2 = arith.addi %1, %c1_i32_0 : i32
    %c0_i32 = arith.constant 0 : i32
    %c0_i32_1 = arith.constant 0 : i32
    return %c0_i32, %2 : i32, i32
  }
  func.func @transform_12(%arg0: i32, %arg1: i32) -> (i32, i32, i32) {
    %c0_i32 = arith.constant 0 : i32
    %c0_i32_0 = arith.constant 0 : i32
    %c0_i32_1 = arith.constant 0 : i32
    return %arg0, %c0_i32, %c0_i32_0 : i32, i32, i32
  }
}

</mosaic_0001>

<bundles_post_ra>
// kernel: conv_block_forward.2
= control target key start
LH: loop header
LB: loop body
LE: loop exit
PB: predicated region body
PF: predicated region fallthrough
CT: control target
= control target key end

     0   :  { %s3788_s23 = smov 0   ;;  %s3790_s24 = smov 0   ;;  %s4991_s0 = inlined_call_operand.vmem [shape: bf16[8,4096], index: 0, kind: input, shape index: {}, may-alias: {0,1,2}]   ;;  %s4992_s1 = inlined_call_operand.vmem [shape: bf16[8,4096], index: 1, kind: input, shape index: {}, may-alias: {0,1,2}]   ;;  %s4993_s2 = inlined_call_operand.vmem [shape: bf16[8,4096], index: 2, kind: input, shape index: {}, may-alias: {0,1,2}]   ;;  %s4994_s3 = inlined_call_operand.vmem [shape: bf16[1,4096], index: 3, kind: input, shape index: {}, may-alias: {3,4,5}]   ;;  %s4995_s4 = inlined_call_operand.vmem [shape: bf16[1,4096], index: 4, kind: input, shape index: {}, may-alias: {3,4,5}]   ;;  %s4996_s5 = inlined_call_operand.vmem [shape: bf16[1,4096], index: 5, kind: input, shape index: {}, may-alias: {3,4,5}]   ;;  %s4997_s6 = inlined_call_operand.vmem [shape: bf16[8,216], index: 6, kind: input, shape index: {}]   ;;  %s4998_s7 = inlined_call_operand.vmem [shape: f32[8,1], index: 7, kind: input, shape index: {}]   ;;  %s4999_s8 = inlined_call_operand.vmem [shape: f32[8,1], index: 8, kind: input, shape index: {}]   ;;  %s5000_s9 = inlined_call_operand.vmem [shape: f32[8,1], index: 9, kind: input, shape index: {}]   ;;  %s5001_s10 = inlined_call_operand.<no memory space> [shape: f32[1,1], index: 10, kind: input, shape index: {}]   ;;  %s5002_s11 = inlined_call_operand.vmem [shape: bf16[8,4096], index: 11, kind: output, shape index: {0}]   ;;  %s5003_s12 = inlined_call_operand.vmem [shape: f32[2,8,2], index: 12, kind: output, shape index: {1}]  }
   0x1   :  { %18 = sst [smem:[#allocation3]] %s5001_s10  ;;  %s3792_s25 = smov 0  }
   0x2 LB: > { %s36_s10 = sadd.s32 1, %s3684_s24  ;;  %p2978_p0 = scmp.ge.s32.totalorder %s3688_s25, 1  ;;  %s3688_s25 = sphi %s3792_s25, %s24_s25   ;;  %s3684_s24 = sphi %s3790_s24, %s5245_s24   ;;  %s3680_s23 = sphi %s3788_s23, %s5244_s23  }
   0x3   : > { %p38_p1 = scmp.ge.s32.totalorder %s36_s10, 2  ;;  %p499_p2 = scmp.lt.s32.totalorder %s3688_s25, 3 }
   0x5   : > { %s5247_s10 = smov (%p38_p1, %s36_s10), 0  ;;  %p500_p3 = pnand %p2978_p0, %p499_p2 }
   0x7   : > { %503 = sbr.rel (%p500_p3) target bundleno = 915 (0x393), region = 64 }
   0xe   : > { %v782_v0 = vld [vmem:[%s4999_s8] sm:$0xff]  ;;  %s3038_s28 = sshll.u32 %s3680_s23, 3  ;;  %v5036_v1 = vmov 0   ;;  %v3691_v2 = vmov 1966171168   ;;  %v719_v4 = vlaneseq  ;;  %s3693_s13 = smov 111  }
   0xf   : > { %3134 = vset.pattern.permute.xlu0 %v5036_v1  ;;  %s3813_s29 = sadd.s32 8, %s3038_s28  ;;  %v717_v3 = vunpack.c.l.s4 %v3691_v2  ;;  %s3043_s30 = sadd.s32 16, %s3038_s28  ;;  %v798_v5 = vld [vmem:[%s5000_s9] sm:$0xff] }
  0x10   : > { %785 = vperm.xlu0 %3134, %v782_v0   ;;  %p598_p4 = scmp.lt.s32.totalorder %s3813_s29, 31  ;;  %p608_p5 = scmp.lt.s32.totalorder %s3043_s30, 31  ;;  %v3822_v7 = vshrl.u32 %v719_v4, 7 }
  0x11   : > { %v718_v6 = vunpack.c.0.s8 %v717_v3  ;;  %s2980_s22 = sadd.s32 4294967295, %s3813_s29  ;;  %s3694_s14 = smov 109  }
  0x12   : > { %s3820_s15 = scalar_select %p598_p4, %s3813_s29, 31  ;;  %5086 = vst [vmem:[#allocation4_spill] sm:$0xff] %v3822_v7  ;;  %v3887_v55 = vsub.s32 0, %v3822_v7 }
  0x13   : > { %s5249_s30 = smov (!%p608_p5, %s3043_s30), 31  ;;  %v721_v10 = vsub.s32 %v718_v6, %v3822_v7  ;;  %p587_p6 = scmp.lt.s32.totalorder %s2980_s22, 31 }
  0x14   : > { %801 = vperm.xlu0 %3134, %v798_v5   ;;  %s3828_s18 = scalar_lea.vmem %s4995_s4, %s3820_s15  ;;  %s640_s21 = scalar_lea.vmem %s4996_s5, %s5249_s30  ;;  %5087 = vst [vmem:[#allocation5_spill] sm:$0xff] %v3887_v55 }
  0x15   : > { %v712_v8 = vld [vmem:[%s3828_s18] sm:$0xff]  ;;  %s5251_s22 = smov (!%p587_p6, %s2980_s22), 31  ;;  %s5004_s29 = sshll.u32 %s3820_s15, 2 }
  0x16   : > { %v715_v9 = vcombine.high %v712_v8, %v712_v8  ;;  %v713_v12 = vld [vmem:[%s640_s21] sm:$0x1]  ;;  %v722_v24 = vrot.slane %v712_v8, %v721_v10  ;;  %s621_s28 = scalar_lea.vmem %s4994_s3, %s5251_s22  ;;  %s3868_s16 = scalar_lea.vmem %s4992_s1, %s5004_s29 }
  0x17   : > { %vm781_vm0 = vcmp.gt.bf16.partialorder %v713_v12, 0  ;;  %v711_v28 = vld [vmem:[%s621_s28] sm:$0x1]  ;;  %s2981_s17 = sshll.u32 %s5251_s22, 2  ;;  %v669_v48 = vld [vmem:[%s3868_s16 + $0x8] sm:$0xff]  ;;  %s2985_s26 = sshll.u32 %s5249_s30, 2 }
  0x18   : > { %v729_v11 = vrot.slane %v715_v9, %v721_v10  ;;  %v823_v18 = vsel %vm781_vm0, 65537, %v5036_v1  ;;  %v730_v25 = vcombine.high %v722_v24, %v722_v24  ;;  %v738_v26 = vrot.slane %v722_v24, %v721_v10  ;;  %v668_v46 = vld [vmem:[%s3868_s16] sm:$0xff]  ;;  %s590_s21 = scalar_lea.vmem %s4991_s0, %s2981_s17  ;;  %v3883_v50 = vld [vmem:[%s3868_s16 + $0x10] sm:$0xff]  ;;  %s611_s30 = scalar_lea.vmem %s4993_s2, %s2985_s26 }
  0x19   : > { %vm772_vm4 = vcmp.gt.bf16.partialorder %v711_v28, 0  ;;  %v2993_v54 = vcombine.low %v668_v46, %v668_v46  ;;  %v667_v56 = vld [vmem:[%s590_s21] sm:$0xf]  ;;  %v2994_v57 = vcombine.high %v668_v46, %v668_v46  ;;  %v2995_v58 = vcombine.low %v669_v48, %v669_v48  ;;  %s3692_s28 = smov 110   ;;  %s3696_s17 = smov 100  }
  0x1a   : > { %v731_v13 = vcombine.high %v729_v11, %v729_v11  ;;  %v745_v14 = vrot.slane %v729_v11, %v721_v10  ;;  %v752_v27 = vrot.slane %v730_v25, %v721_v10  ;;  %v760_v29 = vcombine.high %v738_v26, %v738_v26  ;;  %v672_v3 = vld [vmem:[%s611_s30] sm:$0xf]  ;;  %s3697_s19 = smov 99   ;;  %s3698_s20 = smov 91  }
  0x1b   : > { %vm773_vm5 = vcmp.gt.bf16.partialorder %v738_v26, 0  ;;  %v814_v31 = vsel %vm772_vm4, 65537, %v5036_v1  ;;  %v2996_v59 = vcombine.high %v669_v48, %v669_v48  ;;  %v2997_v60 = vcombine.low %v3883_v50, %v3883_v50  ;;  %s5005_s21 = smov 90   ;;  %s3700_s26 = smov 89  }
  0x1c   : > { %v759_v15 = vrot.slane %v731_v13, %v721_v10  ;;  %v761_v16 = vcombine.high %v745_v14, %v745_v14  ;;  %v762_v30 = vcombine.high %v752_v27, %v752_v27  ;;  %vm774_vm6 = vcmp.gt.bf16.partialorder %v752_v27, 0  ;;  %s5007_s22 = smov 11   ;;  %s3702_s27 = smov 10  }
  0x1d   : > { %vm775_vm7 = vcmp.gt.bf16.partialorder %v760_v29, 0  ;;  %v815_v32 = vsel %vm773_vm5, 65537, %v5036_v1  ;;  %vm777_vm9 = vcmp.gt.bf16.partialorder %v745_v14, 0  ;;  %v816_v33 = vsel %vm774_vm6, 65537, %v5036_v1  ;;  %s5009_s30 = smov 9   ;;  %s5011_s29 = smov 1  }
  0x1e   : > { %v763_v17 = vcombine.high %v759_v15, %v759_v15  ;;  %vm778_vm1 = vcmp.gt.bf16.partialorder %v759_v15, 0  ;;  %vm779_vm2 = vcmp.gt.bf16.partialorder %v761_v16, 0  ;;  %vm776_vm8 = vcmp.gt.bf16.partialorder %v762_v30, 0  ;;  %p654_p7 = scmp.lt.s32.totalorder %s3680_s23, 1 }
  0x1f   : > { %v3840_v19 = vsel %vm778_vm1, 65537, %v5036_v1  ;;  %v3843_v20 = vsel %vm779_vm2, 65537, %v5036_v1  ;;  %v817_v34 = vsel %vm775_vm7, 65537, %v5036_v1  ;;  %v3001_v35 = vcombine.low %v814_v31, %v815_v32 }
  0x20   : > { %vm780_vm3 = vcmp.gt.bf16.partialorder %v763_v17, 0  ;;  %v3004_v22 = vcombine.low %v3840_v19, %v3843_v20  ;;  %v818_v36 = vsel %vm776_vm8, 65537, %v5036_v1  ;;  %v819_v37 = vsel %vm777_vm9, 65537, %v5036_v1  ;;  %s5253_s23 = smov (!%p654_p7, %s3680_s23), 1 }
  0x21   : > { %v822_v21 = vsel %vm780_vm3, 65537, %v5036_v1  ;;  %v3002_v38 = vcombine.low %v816_v33, %v817_v34  ;;  %v3003_v39 = vcombine.low %v818_v36, %v819_v37  ;;  %vm839_vm10 = vcmp.ne.s16.totalorder %v3001_v35, 0 }
  0x22   : > { %v3005_v23 = vcombine.low %v822_v21, %v823_v18  ;;  %v844_v40 = vsel %vm839_vm10, 65537, %v5036_v1  ;;  %vm842_vm1 = vcmp.ne.s16.totalorder %v3004_v22, 0  ;;  %v701_v63 = vunpack.c.l.bf16 %v667_v56 }
  0x23   : > { %vm840_vm11 = vcmp.ne.s16.totalorder %v3002_v38, 0  ;;  %vm841_vm12 = vcmp.ne.s16.totalorder %v3003_v39, 0  ;;  %v849_v42 = vunpack.c.l.b16 %v844_v40  ;;  %v850_v45 = vunpack.c.h.b16 %v844_v40  ;;  %v3940_v38 = vld [vmem:[%s3868_s16 + $0x18] sm:$0xff]  ;;  %s3695_s16 = smov 101  }
  0x24   : > { %vm843_vm13 = vcmp.ne.s16.totalorder %v3005_v23, 0  ;;  %v845_v41 = vsel %vm840_vm11, 65537, %v5036_v1  ;;  %v846_v43 = vsel %vm841_vm12, 65537, %v5036_v1  ;;  %v702_v0 = vunpack.c.l.bf16 %v2993_v54 }
  0x25   : > { %v3874_v44 = vsel %vm843_vm13, 65537, %v5036_v1  ;;  %v851_v47 = vunpack.c.l.b16 %v845_v41  ;;  %v852_v49 = vunpack.c.h.b16 %v845_v41  ;;  %v853_v51 = vunpack.c.l.b16 %v846_v43 }
  0x26   : > { %v854_v52 = vunpack.c.h.b16 %v846_v43  ;;  %v858_v53 = vunpack.c.h.b16 %v3874_v44  ;;  %vm859_vm14 = vcmp.ne.s32.totalorder %v849_v42, 0  ;;  %vm860_vm15 = vcmp.ne.s32.totalorder %v850_v45, 0 }
  0x27   : > { %vm861_vm0 = vcmp.ne.s32.totalorder %v851_v47, 0  ;;  %vm862_vm2 = vcmp.ne.s32.totalorder %v852_v49, 0  ;;  %v869_v61 = vsel %vm859_vm14, 1, %v5036_v1  ;;  %vm863_vm3 = vcmp.ne.s32.totalorder %v853_v51, 0 }
  0x28   : > { %vm864_vm4 = vcmp.ne.s32.totalorder %v854_v52, 0  ;;  %vm868_vm5 = vcmp.ne.s32.totalorder %v858_v53, 0  ;;  %v870_v62 = vsel %vm860_vm15, 1, %v5036_v1  ;;  %v871_v2 = vsel %vm861_vm0, 1, %v5036_v1 }
  0x29   : > { %v703_v4 = vunpack.c.l.bf16 %v2994_v57  ;;  %v847_v5 = vsel %vm842_vm1, 65537, %v5036_v1  ;;  %v872_v6 = vsel %vm862_vm2, 1, %v5036_v1  ;;  %v882_v8 = vrot.slane %v869_v61, %v3887_v55 }
  0x2a   : > { %v873_v9 = vsel %vm863_vm3, 1, %v5036_v1  ;;  %v874_v10 = vsel %vm864_vm4, 1, %v5036_v1  ;;  %v878_v11 = vsel %vm868_vm5, 1, %v5036_v1  ;;  %v886_v12 = vrot.slane %v870_v62, %v3887_v55 }
  0x2b   : > { %v704_v14 = vunpack.c.l.bf16 %v2995_v58  ;;  %v705_v15 = vunpack.c.l.bf16 %v2996_v59  ;;  %v706_v16 = vunpack.c.l.bf16 %v2997_v60  ;;  %v890_v17 = vrot.slane %v871_v2, %v3887_v55 }
  0x2c   : > { %v710_v18 = vunpack.c.l.bf16 %v672_v3  ;;  %v855_v19 = vunpack.c.l.b16 %v847_v5  ;;  %v894_v20 = vrot.slane %v872_v6, %v3887_v55  ;;  %v898_v21 = vrot.slane %v873_v9, %v3887_v55 }
  0x2d   : > { %v902_v22 = vrot.slane %v874_v10, %v3887_v55  ;;  %v918_v23 = vrot.slane %v878_v11, %v3887_v55  ;;  %vm3911_vm6 = vcmp.eq.s32.totalorder %v882_v8, 1  ;;  %vm3918_vm7 = vcmp.eq.s32.totalorder %v886_v12, 1 }
  0x2e   : > { %vm3927_vm8 = vcmp.eq.s32.totalorder %v890_v17, 1  ;;  %v856_v41 = vunpack.c.h.b16 %v847_v5  ;;  %vm3957_vm10 = vcmp.eq.s32.totalorder %v894_v20, 1  ;;  %vm3961_vm11 = vcmp.eq.s32.totalorder %v898_v21, 1 }
  0x2f   : > { %vm928_vm9 = vcmp.eq.s32.totalorder %v918_v23, 1  ;;  %vm3965_vm12 = vcmp.eq.s32.totalorder %v902_v22, 1  ;;  %v2998_v52 = vcombine.high %v3883_v50, %v3883_v50  ;;  %v2999_v53 = vcombine.low %v3940_v38, %v3940_v38 }
  0x30   : > { %vm865_vm13 = vcmp.ne.s32.totalorder %v855_v19, 0  ;;  %vm866_vm14 = vcmp.ne.s32.totalorder %v856_v41, 0  ;;  %vm1009_vm1 = vcmask 900096   ;;  %vm966_vm2 = vcmask 908288  }
  0x31   : > { %v707_v60 = vunpack.c.l.bf16 %v2998_v52  ;;  %v708_v61 = vunpack.c.l.bf16 %v2999_v53  ;;  %v875_v62 = vsel %vm865_vm13, 1, %v5036_v1  ;;  %v876_v2 = vsel %vm866_vm14, 1, %v5036_v1 }
  0x32   : > { %v906_v5 = vrot.slane %v875_v62, %v3887_v55  ;;  %v910_v6 = vrot.slane %v876_v2, %v3887_v55  ;;  %vm5060_vm3 = vcmask 891904   ;;  %vm5035_vm4 = vcmask 826368  }
  0x33   : > { %vm2416_vm14 = vcmask 719872  }
  0x34   : > { %vm4025_vm15 = vcmp.eq.s32.totalorder %v906_v5, 1  ;;  %vm4031_vm0 = vcmp.eq.s32.totalorder %v910_v6, 1 }
  0x8f   : > { %v3904_v13 = vpop.permute.xlu0 %785 }
  0x90   : > { %v788_v25 = vmul.f32 %v3904_v13, %v701_v63  ;;  %v789_v26 = vmul.f32 %v3904_v13, %v702_v0  ;;  %v790_v27 = vmul.f32 %v3904_v13, %v703_v4  ;;  %v791_v29 = vmul.f32 %v3904_v13, %v704_v14 }
  0x91   : > { %v792_v30 = vmul.f32 %v3904_v13, %v705_v15  ;;  %v793_v31 = vmul.f32 %v3904_v13, %v706_v16  ;;  %v797_v34 = vmul.f32 %v3904_v13, %v710_v18  ;;  %v794_v3 = vmul.f32 %v3904_v13, %v707_v60 }
  0x92   : > { %v795_v4 = vmul.f32 %v3904_v13, %v708_v61  ;;  %v5103_v14 = vmov 0 }
  0x93   : > { %v3925_v32 = vpop.permute.xlu0 %801  ;;  %v5104_v14 = vsel %vm4031_vm0, 4294967295, %v5103_v14 }
  0x94   : > { %v804_v35 = vadd.f32 %v3925_v32, %v788_v25  ;;  %v3934_v36 = vadd.f32 %v3925_v32, %v789_v26  ;;  %v3937_v37 = vadd.f32 %v3925_v32, %v790_v27  ;;  %v3943_v39 = vadd.f32 %v3925_v32, %v791_v29  ;;  %5105 = vst [vmem:[#allocation7_spill] sm:$0xff] %v5104_v14 }
  0x95   : > { %v3946_v40 = vadd.f32 %v3925_v32, %v792_v30  ;;  %v3949_v42 = vadd.f32 %v3925_v32, %v793_v31  ;;  %v813_v43 = vadd.f32 %v3925_v32, %v797_v34  ;;  %v4014_v9 = vadd.f32 %v3925_v32, %v794_v3 }
  0x96   : > { %v929_v45 = vsel %vm3911_vm6, %v804_v35, 0.0  ;;  %v930_v46 = vsel %vm3918_vm7, %v3934_v36, 0.0  ;;  %v931_v51 = vsel %vm3927_vm8, %v3937_v37, 0.0  ;;  %v3983_v58 = vsel %vm3957_vm10, %v3943_v39, 0.0 }
  0x97   : > { %v3976_v54 = vsel %vm928_vm9, %v813_v43, 0.0  ;;  %v3978_v56 = vpack.i.bf16 %v931_v51, %v930_v46  ;;  %v3135_v57 = vpack.i.bf16 %v930_v46, %v929_v45  ;;  %v3988_v59 = vsel %vm3961_vm11, %v3946_v40, 0.0 }
  0x98   : > { %v3993_v50 = vsel %vm3965_vm12, %v3949_v42, 0.0  ;;  %v4002_v0 = vpack.i.bf16 %v3983_v58, %v931_v51  ;;  %v3150_v8 = vpack.i.bf16 %v3983_v58, %v929_v45  ;;  %v4017_v10 = vadd.f32 %v3925_v32, %v795_v4 }
  0x99   : > { %3146 = vrot.lane.b32.xlu0 %v3978_v56, %s3692_s28  ;;  %3136 = vrot.lane.b32.xlu1 %v3135_v57, %s3693_s13  ;;  %v3155_v63 = vpack.i.bf16 %v3993_v50, %v3988_v59  ;;  %v4023_v11 = vpack.i.bf16 %v3988_v59, %v930_v46  ;;  %v3475_v15 = vpack.i.bf16 %v3988_v59, %v3983_v58  ;;  %v935_v16 = vsel %vm4025_vm15, %v4014_v9, 0.0 }
  0x9a   : > { %5100 = vst [vmem:[#allocation6_spill] sm:$0xff] %v4017_v10  ;;  %v4046_v17 = vsel %vm4031_vm0, %v4017_v10, 0.0  ;;  %v3355_v19 = vpack.i.bf16 %v935_v16, %v3993_v50  ;;  %vm5042_vm6 = vcmask 818176   ;;  %vm5041_vm9 = vcmask 809984  }
  0x9b   : > { %v4052_v18 = vpack.i.bf16 %v4046_v17, %v935_v16 }
  0x9d   : > { %3156 = vrot.lane.b32.xlu0 %v3155_v63, %s3693_s13  ;;  %3141 = vrot.lane.b32.xlu1 %v4002_v0, %s3693_s13 }
  0xa1   : > { %3166 = vrot.lane.b32.xlu0 %v3978_v56, %s3694_s14  ;;  %3151 = vrot.lane.b32.xlu1 %v3150_v8, %s3692_s28 }
  0xa5   : > { %3176 = vrot.lane.b32.xlu0 %v3150_v8, %s3694_s14  ;;  %3161 = vrot.lane.b32.xlu1 %v3155_v63, %s3692_s28 }
  0xa9   : > { %3186 = vrot.lane.b32.xlu0 %v3155_v63, %s3694_s14  ;;  %3171 = vrot.lane.b32.xlu1 %v3978_v56, %s3695_s16 }
  0xad   : > { %3196 = vrot.lane.b32.xlu0 %v3978_v56, %s3696_s17  ;;  %3181 = vrot.lane.b32.xlu1 %v3150_v8, %s3695_s16 }
  0xb1   : > { %3206 = vrot.lane.b32.xlu0 %v3150_v8, %s3696_s17  ;;  %3191 = vrot.lane.b32.xlu1 %v3155_v63, %s3695_s16 }
  0xb5   : > { %3216 = vrot.lane.b32.xlu0 %v3155_v63, %s3696_s17  ;;  %3201 = vrot.lane.b32.xlu1 %v3978_v56, %s3697_s19 }
  0xb9   : > { %3226 = vrot.lane.b32.xlu0 %v3978_v56, %s3698_s20  ;;  %3211 = vrot.lane.b32.xlu1 %v3150_v8, %s3697_s19 }
  0xbd   : > { %3236 = vrot.lane.b32.xlu0 %v3150_v8, %s3698_s20  ;;  %3221 = vrot.lane.b32.xlu1 %v3155_v63, %s3697_s19 }
  0xc1   : > { %3246 = vrot.lane.b32.xlu0 %v3155_v63, %s3698_s20  ;;  %3231 = vrot.lane.b32.xlu1 %v3978_v56, %s5005_s21 }
  0xc5   : > { %3256 = vrot.lane.b32.xlu0 %v3978_v56, %s3700_s26  ;;  %3241 = vrot.lane.b32.xlu1 %v3150_v8, %s5005_s21 }
  0xc9   : > { %3266 = vrot.lane.b32.xlu0 %v3150_v8, %s3700_s26  ;;  %3251 = vrot.lane.b32.xlu1 %v3155_v63, %s5005_s21  ;;  %s5013_s21 = smov 119  }
  0xcd   : > { %3276 = vrot.lane.b32.xlu0 %v3155_v63, %s3700_s26  ;;  %3261 = vrot.lane.b32.xlu1 %v3978_v56, %s5007_s22 }
  0xd1   : > { %3286 = vrot.lane.b32.xlu0 %v3978_v56, %s3702_s27  ;;  %3271 = vrot.lane.b32.xlu1 %v3150_v8, %s5007_s22 }
  0xd5   : > { %3296 = vrot.lane.b32.xlu0 %v3150_v8, %s3702_s27  ;;  %3281 = vrot.lane.b32.xlu1 %v3155_v63, %s5007_s22  ;;  %s5015_s22 = smov 127  }
  0xd9   : > { %3306 = vrot.lane.b32.xlu0 %v3155_v63, %s3702_s27  ;;  %3291 = vrot.lane.b32.xlu1 %v3978_v56, %s5009_s30 }
  0xdd   : > { %3316 = vrot.lane.b32.xlu0 %v3978_v56, %s5011_s29  ;;  %3301 = vrot.lane.b32.xlu1 %v3150_v8, %s5009_s30 }
  0xe1   : > { %3326 = vrot.lane.b32.xlu0 %v3155_v63, %s5011_s29  ;;  %3311 = vrot.lane.b32.xlu1 %v3155_v63, %s5009_s30  ;;  %s5017_s30 = smov 117  }
  0xe5   : > { %3336 = vrot.lane.b32.xlu0 %v4002_v0, %s5013_s21  ;;  %3321 = vrot.lane.b32.xlu1 %v3150_v8, %s5011_s29  ;;  %s5019_s29 = smov 118  }
  0xe9   : > { %3346 = vrot.lane.b32.xlu0 %v4023_v11, %s5013_s21  ;;  %3331 = vrot.lane.b32.xlu1 %v4002_v0, %s5015_s22 }
  0xed   : > { %3356 = vrot.lane.b32.xlu0 %v3355_v19, %s5013_s21  ;;  %3341 = vrot.lane.b32.xlu1 %v4023_v11, %s5015_s22  ;;  %s5021_s21 = smov 38  }
  0xf1   : > { %3366 = vrot.lane.b32.xlu0 %v4002_v0, %s5017_s30  ;;  %3351 = vrot.lane.b32.xlu1 %v3355_v19, %s5015_s22  ;;  %s5033_s22 = smov 39  }
  0xf5   : > { %3376 = vrot.lane.b32.xlu0 %v4023_v11, %s5017_s30  ;;  %3361 = vrot.lane.b32.xlu1 %v4002_v0, %s5019_s29 }
  0xf9   : > { %3386 = vrot.lane.b32.xlu0 %v3355_v19, %s5017_s30  ;;  %3371 = vrot.lane.b32.xlu1 %v4023_v11, %s5019_s29  ;;  %s5023_s30 = smov 29  }
  0xfd   : > { %3396 = vrot.lane.b32.xlu0 %v4002_v0, %s5021_s21  ;;  %3381 = vrot.lane.b32.xlu1 %v3355_v19, %s5019_s29  ;;  %s5031_s29 = smov 37  }
 0x101   : > { %3406 = vrot.lane.b32.xlu0 %v4023_v11, %s5021_s21  ;;  %3391 = vrot.lane.b32.xlu1 %v4002_v0, %s5033_s22 }
 0x105   : > { %1739 = vrot.lane.b32.xlu0 %v3993_v50, %s5021_s21  ;;  %3401 = vrot.lane.b32.xlu1 %v4023_v11, %s5033_s22  ;;  %s5025_s21 = smov 27  }
 0x109   : > { %3416 = vrot.lane.b32.xlu0 %v4002_v0, %s5023_s30  ;;  %1696 = vrot.lane.b32.xlu1 %v3993_v50, %s5033_s22  ;;  %s5121_s22 = smov 37  }
 0x10b   : > { %v3147_v20 = vpop.permute.xlu0 %3146  ;;  %v3137_v21 = vpop.permute.xlu1 %3136 }
 0x10c   : > { %v3149_v22 = vunpack.i.h.bf16 %v3147_v20  ;;  %v3148_v23 = vunpack.i.l.bf16 %v3147_v20  ;;  %v3139_v26 = vunpack.i.h.bf16 %v3137_v21  ;;  %v3138_v29 = vunpack.i.l.bf16 %v3137_v21 }
 0x10d   : > { %3426 = vrot.lane.b32.xlu0 %v4023_v11, %s5023_s30  ;;  %3411 = vrot.lane.b32.xlu1 %v4002_v0, %s5031_s29 }
 0x10e   : > { %v1011_v31 = vsel %vm1009_vm1, %v3148_v23, %v3149_v22  ;;  %v967_v53 = vsel %vm966_vm2, %v3138_v29, %v3139_v26 }
 0x10f   : > { %v4128_v24 = vpop.permute.xlu0 %3156  ;;  %v3142_v25 = vpop.permute.xlu1 %3141 }
 0x110   : > { %v3143_v27 = vunpack.i.l.bf16 %v3142_v25  ;;  %v5050_v45 = vunpack.i.h.bf16 %v4128_v24  ;;  %v3158_v46 = vunpack.i.l.bf16 %v4128_v24  ;;  %v3144_v51 = vunpack.i.h.bf16 %v3142_v25 }
 0x111   : > { %1825 = vrot.lane.b32.xlu0 %v3993_v50, %s5023_s30  ;;  %3421 = vrot.lane.b32.xlu1 %v4023_v11, %s5031_s29  ;;  %s5027_s30 = smov 28  }
 0x112   : > { %v968_v30 = vsel %vm966_vm2, %v3139_v26, %v3143_v27  ;;  %v4155_v3 = vsel %vm966_vm2, %v3158_v46, %v5050_v45  ;;  %v970_v5 = vsel %vm966_vm2, %v3144_v51, %v3158_v46 }
 0x113   : > { %v4136_v34 = vpop.permute.xlu0 %3166  ;;  %v3152_v35 = vpop.permute.xlu1 %3151  ;;  %v2293_v41 = vpack.c.bf16 %v1011_v31, %v968_v30  ;;  %v969_v30 = vsel %vm966_vm2, %v3143_v27, %v3144_v51  ;;  %v857_v31 = vunpack.c.l.b16 %v3874_v44 }
 0x114   : > { %v3153_v43 = vunpack.i.l.bf16 %v3152_v35  ;;  %v3154_v52 = vunpack.i.h.bf16 %v3152_v35  ;;  %v3169_v4 = vunpack.i.h.bf16 %v4136_v34  ;;  %v3168_v6 = vunpack.i.l.bf16 %v4136_v34 }
 0x115   : > { %3436 = vrot.lane.b32.xlu0 %v4002_v0, %s5025_s21  ;;  %1782 = vrot.lane.b32.xlu1 %v3993_v50, %s5031_s29  ;;  %vm867_vm5 = vcmp.ne.s32.totalorder %v857_v31, 0  ;;  %s5110_s29 = smov 90  }
 0x116   : > { %2445 = vmatprep.subr.bf16.mxu0 %v2293_v41  ;;  %v1010_v57 = vsel %vm1009_vm1, %v3153_v43, %v3148_v23  ;;  %v1012_v19 = vsel %vm1009_vm1, %v3149_v22, %v3154_v52  ;;  %v1054_v41 = vsel %vm5060_vm3, %v3168_v6, %v3169_v4  ;;  %v877_v31 = vsel %vm867_vm5, 1, %v5036_v1 }
 0x117   : > { %v4146_v60 = vpop.permute.xlu0 %3176  ;;  %v4148_v61 = vpop.permute.xlu1 %3161  ;;  %v2292_v62 = vpack.c.bf16 %v1010_v57, %v967_v53  ;;  %v2294_v22 = vpack.c.bf16 %v1012_v19, %v969_v30  ;;  %vm5049_vm5 = vcmask 744448  }
 0x118   : > { %v5046_v63 = vunpack.i.h.bf16 %v4148_v61  ;;  %v3163_v2 = vunpack.i.l.bf16 %v4148_v61  ;;  %v3178_v35 = vunpack.i.l.bf16 %v4146_v60 }
 0x119   : > { %3446 = vrot.lane.b32.xlu0 %v4023_v11, %s5025_s21  ;;  %3431 = vrot.lane.b32.xlu1 %v4002_v0, %s5027_s30 }
 0x11a   : > { %v4167_v8 = vsel %vm1009_vm1, %v3163_v2, %v5046_v63  ;;  %2446 = vmatpush1.bf16.msra.mxu0 %v2292_v62  ;;  %v1013_v16 = vsel %vm1009_vm1, %v3154_v52, %v3163_v2  ;;  %v1053_v62 = vsel %vm5060_vm3, %v3178_v35, %v3168_v6 }
 0x11b   : > { %v4171_v20 = vpop.permute.xlu0 %3186  ;;  %v3172_v21 = vpop.permute.xlu1 %3171  ;;  %v2295_v23 = vpack.c.bf16 %v1013_v16, %v970_v5  ;;  %v3179_v5 = vunpack.i.h.bf16 %v4146_v60 }
 0x11c   : > { %v3174_v26 = vunpack.i.h.bf16 %v3172_v21  ;;  %v3173_v29 = vunpack.i.l.bf16 %v3172_v21  ;;  %v5044_v53 = vunpack.i.h.bf16 %v4171_v20  ;;  %v3188_v57 = vunpack.i.l.bf16 %v4171_v20 }
 0x11d   : > { %1911 = vrot.lane.b32.xlu0 %v3993_v50, %s5025_s21  ;;  %3441 = vrot.lane.b32.xlu1 %v4023_v11, %s5027_s30  ;;  %s5029_s21 = smov 18  }
 0x11e   : > { %2486 = vmatprep.subr.bf16.mxu1 %v2295_v23  ;;  %v1097_v43 = vsel %vm5035_vm4, %v3173_v29, %v3174_v26  ;;  %v3000_v23 = vcombine.high %v3940_v38, %v3940_v38  ;;  %v4209_v6 = vsel %vm5060_vm3, %v3188_v57, %v5044_v53  ;;  %v1056_v38 = vsel %vm5060_vm3, %v3179_v5, %v3188_v57 }
 0x11f   : > { %2487 = vmatpush1.bf16.msra.mxu1 %v2294_v22  ;;  %v4186_v27 = vpop.permute.xlu0 %3196  ;;  %v3182_v46 = vpop.permute.xlu1 %3181  ;;  %v2301_v51 = vpack.c.bf16 %v1097_v43, %v1054_v41 }
 0x120   : > { %v3183_v52 = vunpack.i.l.bf16 %v3182_v46  ;;  %v3184_v44 = vunpack.i.h.bf16 %v3182_v46  ;;  %v3199_v60 = vunpack.i.h.bf16 %v4186_v27 }
 0x121   : > { %3456 = vrot.lane.b32.xlu0 %v4002_v0, %s5029_s21  ;;  %1868 = vrot.lane.b32.xlu1 %v3993_v50, %s5027_s30  ;;  %s3716_s30 = smov 19  }
 0x122   : > { %2447 = vmatprep.subr.bf16.mxu0 %v2301_v51  ;;  %v1096_v2 = vsel %vm5035_vm4, %v3183_v52, %v3173_v29  ;;  %v3198_v29 = vunpack.i.l.bf16 %v4186_v27  ;;  %v1098_v43 = vsel %vm5035_vm4, %v3174_v26, %v3184_v44 }
 0x123   : > { %v4197_v16 = vpop.permute.xlu0 %3206  ;;  %v4199_v19 = vpop.permute.xlu1 %3191  ;;  %v2300_v21 = vpack.c.bf16 %v1096_v2, %v1053_v62  ;;  %v1055_v2 = vsel %vm5060_vm3, %v3169_v4, %v3179_v5 }
 0x124   : > { %v5040_v30 = vunpack.i.h.bf16 %v4199_v19  ;;  %v3193_v22 = vunpack.i.l.bf16 %v4199_v19  ;;  %v2302_v26 = vpack.c.bf16 %v1098_v43, %v1055_v2 }
 0x125   : > { %3466 = vrot.lane.b32.xlu0 %v4023_v11, %s5029_s21  ;;  %3451 = vrot.lane.b32.xlu1 %v4002_v0, %s3716_s30 }
 0x126   : > { %v4221_v35 = vsel %vm5035_vm4, %v3193_v22, %v5040_v30  ;;  %2448 = vmatpush1.bf16.msra.mxu0 %v2300_v21  ;;  %v1099_v41 = vsel %vm5035_vm4, %v3184_v44, %v3193_v22  ;;  %v914_v21 = vrot.slane %v877_v31, %v3887_v55  ;;  %v709_v44 = vunpack.c.l.bf16 %v3000_v23 }
 0x127   : > { %v4225_v46 = vpop.permute.xlu0 %3216  ;;  %v3202_v51 = vpop.permute.xlu1 %3201  ;;  %v2303_v52 = vpack.c.bf16 %v1099_v41, %v1056_v38  ;;  %v3208_v22 = vunpack.i.l.bf16 %v4197_v16  ;;  %v1140_v38 = vsel %vm5042_vm6, %v3198_v29, %v3199_v60  ;;  %vm5047_vm4 = vcmask 736256  }
 0x128   : > { %v3204_v57 = vunpack.i.h.bf16 %v3202_v51  ;;  %v3203_v62 = vunpack.i.l.bf16 %v3202_v51  ;;  %vm4244_vm13 = vcmp.eq.s32.totalorder %v914_v21, 1  ;;  %v3218_v23 = vunpack.i.l.bf16 %v4225_v46 }
 0x129   : > { %1997 = vrot.lane.b32.xlu0 %v3993_v50, %s5029_s21  ;;  %3461 = vrot.lane.b32.xlu1 %v4023_v11, %s3716_s30  ;;  %v5039_v11 = vunpack.i.h.bf16 %v4225_v46  ;;  %s3717_s21 = smov 17   ;;  %v796_v43 = vmul.f32 %v3904_v13, %v709_v44  ;;  %v1139_v2 = vsel %vm5042_vm6, %v3208_v22, %v3198_v29 }
 0x12a   : > { %2488 = vmatprep.subr.bf16.mxu1 %v2303_v52  ;;  %v1183_v34 = vsel %vm5041_vm9, %v3203_v62, %v3204_v57 }
 0x12b   : > { %2489 = vmatpush1.bf16.msra.mxu1 %v2302_v26  ;;  %v4242_v4 = vpop.permute.xlu0 %3226  ;;  %v3212_v5 = vpop.permute.xlu1 %3211  ;;  %v2309_v31 = vpack.c.bf16 %v1183_v34, %v1140_v38  ;;  %v4262_v26 = vld [vmem:[%s4997_s6] sm:$0xff]  ;;  %v3209_v38 = vunpack.i.h.bf16 %v4197_v16  ;;  %v4274_v29 = vadd.f32 %v3925_v32, %v796_v43  ;;  %v4281_v16 = vsel %vm5042_vm6, %v3218_v23, %v5039_v11 }
 0x12c   : > { %v3213_v41 = vunpack.i.l.bf16 %v3212_v5  ;;  %v3214_v52 = vunpack.i.h.bf16 %v3212_v5  ;;  %v4271_v13 = vcombine.high %v4262_v26, %v4262_v26  ;;  %v3229_v22 = vunpack.i.h.bf16 %v4242_v4 }
 0x12d   : > { %3476 = vrot.lane.b32.xlu0 %v3475_v15, %s3717_s21  ;;  %1954 = vrot.lane.b32.xlu1 %v3993_v50, %s3716_s30  ;;  %5108 = vst [vmem:[#allocation8_spill] sm:$0xff] %v4274_v29  ;;  %v1142_v32 = vsel %vm5042_vm6, %v3209_v38, %v3218_v23  ;;  %v3228_v34 = vunpack.i.l.bf16 %v4242_v4  ;;  %v4308_v23 = vsel %vm4244_vm13, %v4274_v29, 0.0 }
 0x12e   : > { %2449 = vmatprep.subr.bf16.mxu0 %v2309_v31  ;;  %v1182_v21 = vsel %vm5041_vm9, %v3213_v41, %v3203_v62  ;;  %v1184_v41 = vsel %vm5041_vm9, %v3204_v57, %v3214_v52  ;;  %3009 = vmatprep.mubr.msk.bf16.mxu0 %vm2416_vm14, %v4271_v13 }
 0x12f   : > { %v4265_v58 = vpop.permute.xlu0 %3236  ;;  %v4267_v59 = vpop.permute.xlu1 %3221  ;;  %v2308_v15 = vpack.c.bf16 %v1182_v21, %v1139_v2  ;;  %3011 = vmatprep.mubr.msk.bf16.mxu1 %vm2416_vm14, %v4271_v13 }
 0x130   : > { %v5038_v62 = vunpack.i.h.bf16 %v4267_v59  ;;  %v3223_v44 = vunpack.i.l.bf16 %v4267_v59 }
 0x131   : > { %3486 = vrot.lane.b32.xlu0 %v4052_v18, %s3692_s28  ;;  %3471 = vrot.lane.b32.xlu1 %v3978_v56, %s3717_s21 }
 0x132   : > { %v4293_v5 = vsel %vm5041_vm9, %v3223_v44, %v5038_v62  ;;  %2450 = vmatpush1.bf16.msra.mxu0 %v2308_v15  ;;  %v1185_v31 = vsel %vm5041_vm9, %v3214_v52, %v3223_v44  ;;  %v1141_v15 = vsel %vm5042_vm6, %v3199_v60, %v3209_v38  ;;  %vm5059_vm9 = vcmask 728064  }
 0x133   : > { %v4297_v43 = vpop.permute.xlu0 %3246  ;;  %v3232_v2 = vpop.permute.xlu1 %3231  ;;  %v2311_v21 = vpack.c.bf16 %v1185_v31, %v1142_v32  ;;  %v2310_v44 = vpack.c.bf16 %v1184_v41, %v1141_v15  ;;  %v3238_v32 = vunpack.i.l.bf16 %v4265_v58  ;;  %v1226_v31 = vsel %vm5049_vm5, %v3228_v34, %v3229_v22 }
 0x134   : > { %v3234_v57 = vunpack.i.h.bf16 %v3232_v2  ;;  %v3233_v52 = vunpack.i.l.bf16 %v3232_v2  ;;  %v5043_v56 = vunpack.i.h.bf16 %v4297_v43  ;;  %v3248_v62 = vunpack.i.l.bf16 %v4297_v43 }
 0x135   : > { %964 = vrot.lane.b32.xlu0 %v4308_v23, %s3693_s13  ;;  %3481 = vrot.lane.b32.xlu1 %v4052_v18, %s3693_s13  ;;  %vm5052_vm6 = vcmask 89088   ;;  %s5114_s13 = smov 1  }
 0x136   : > { %2490 = vmatprep.subr.bf16.mxu1 %v2311_v21  ;;  %v1269_v2 = vsel %vm5047_vm4, %v3233_v52, %v3234_v57  ;;  %v1225_v21 = vsel %vm5049_vm5, %v3238_v32, %v3228_v34 }
 0x137   : > { %2491 = vmatpush1.bf16.msra.mxu1 %v2310_v44  ;;  %v4322_v27 = vpop.permute.xlu0 %3256  ;;  %v3242_v60 = vpop.permute.xlu1 %3241  ;;  %v2317_v38 = vpack.c.bf16 %v1269_v2, %v1226_v31  ;;  %v3239_v44 = vunpack.i.h.bf16 %v4265_v58 }
 0x138   : > { %v3243_v1 = vunpack.i.l.bf16 %v3242_v60  ;;  %v3244_v41 = vunpack.i.h.bf16 %v3242_v60  ;;  %v3259_v34 = vunpack.i.h.bf16 %v4322_v27  ;;  %v3258_v58 = vunpack.i.l.bf16 %v4322_v27 }
 0x139   : > { %3491 = vrot.lane.b32.xlu0 %v4052_v18, %s3694_s14  ;;  %2040 = vrot.lane.b32.xlu1 %v3993_v50, %s3717_s21  ;;  %v4342_v50 = vsel %vm5049_vm5, %v3248_v62, %v5043_v56 }
 0x13a   : > { %2451 = vmatprep.subr.bf16.mxu0 %v2317_v38  ;;  %v1268_v15 = vsel %vm5047_vm4, %v3243_v1, %v3233_v52  ;;  %v1228_v1 = vsel %vm5049_vm5, %v3239_v44, %v3248_v62  ;;  %v1270_v60 = vsel %vm5047_vm4, %v3234_v57, %v3244_v41  ;;  %v1312_v57 = vsel %vm5059_vm9, %v3258_v58, %v3259_v34 }
 0x13b   : > { %v4333_v31 = vpop.permute.xlu0 %3266  ;;  %v4335_v2 = vpop.permute.xlu1 %3251  ;;  %v2316_v11 = vpack.c.bf16 %v1268_v15, %v1225_v21 }
 0x13c   : > { %v5045_v0 = vunpack.i.h.bf16 %v4335_v2  ;;  %v3253_v30 = vunpack.i.l.bf16 %v4335_v2 }
 0x13d   : > { %1050 = vrot.lane.b32.xlu0 %v4308_v23, %s3694_s14  ;;  %1007 = vrot.lane.b32.xlu1 %v4308_v23, %s3692_s28  ;;  %s5113_s28 = smov 11   ;;  %s5115_s14 = smov 9  }
 0x13e   : > { %v4354_v52 = vsel %vm5047_vm4, %v3253_v30, %v5045_v0  ;;  %2452 = vmatpush1.bf16.msra.mxu0 %v2316_v11  ;;  %v1271_v32 = vsel %vm5047_vm4, %v3244_v41, %v3253_v30  ;;  %v1227_v0 = vsel %vm5049_vm5, %v3229_v22, %v3239_v44  ;;  %v3268_v11 = vunpack.i.l.bf16 %v4333_v31 }
 0x13f   : > { %v4358_v38 = vpop.permute.xlu0 %3276  ;;  %v3262_v21 = vpop.permute.xlu1 %3261  ;;  %v2319_v15 = vpack.c.bf16 %v1271_v32, %v1228_v1  ;;  %v2318_v30 = vpack.c.bf16 %v1270_v60, %v1227_v0  ;;  %vm5065_vm4 = vcmask 80896   ;;  %vm5064_vm5 = vcmask 72704  }
 0x140   : > { %v3264_v56 = vunpack.i.h.bf16 %v3262_v21  ;;  %v3263_v53 = vunpack.i.l.bf16 %v3262_v21  ;;  %v5048_v32 = vunpack.i.h.bf16 %v4358_v38  ;;  %v3278_v21 = vunpack.i.l.bf16 %v4358_v38 }
 0x141   : > { %3501 = vrot.lane.b32.xlu0 %v4052_v18, %s3696_s17  ;;  %3496 = vrot.lane.b32.xlu1 %v4052_v18, %s3695_s16  ;;  %v1311_v60 = vsel %vm5059_vm9, %v3268_v11, %v3258_v58 }
 0x142   : > { %2492 = vmatprep.subr.bf16.mxu1 %v2319_v15  ;;  %v1355_v41 = vsel %vm5052_vm6, %v3263_v53, %v3264_v56 }
 0x143   : > { %2493 = vmatpush1.bf16.msra.mxu1 %v2318_v30  ;;  %v4374_v4 = vpop.permute.xlu0 %3286  ;;  %v3272_v22 = vpop.permute.xlu1 %3271  ;;  %v2325_v44 = vpack.c.bf16 %v1355_v41, %v1312_v57  ;;  %v3269_v30 = vunpack.i.h.bf16 %v4333_v31 }
 0x144   : > { %v3273_v1 = vunpack.i.l.bf16 %v3272_v22  ;;  %v3274_v0 = vunpack.i.h.bf16 %v3272_v22  ;;  %v4394_v22 = vsel %vm5059_vm9, %v3278_v21, %v5048_v32  ;;  %v3288_v31 = vunpack.i.l.bf16 %v4374_v4 }
 0x145   : > { %1136 = vrot.lane.b32.xlu0 %v4308_v23, %s3696_s17  ;;  %1093 = vrot.lane.b32.xlu1 %v4308_v23, %s3695_s16  ;;  %v5112_v29 = vunpack.i.h.bf16 %v4374_v4  ;;  %s5116_s16 = smov 127   ;;  %s5117_s17 = smov 118  }
 0x146   : > { %2453 = vmatprep.subr.bf16.mxu0 %v2325_v44  ;;  %v1354_v15 = vsel %vm5052_vm6, %v3273_v1, %v3263_v53  ;;  %v1314_v53 = vsel %vm5059_vm9, %v3269_v30, %v3278_v21  ;;  %v1356_v1 = vsel %vm5052_vm6, %v3264_v56, %v3274_v0 }
 0x147   : > { %v4385_v57 = vpop.permute.xlu0 %3296  ;;  %v4387_v41 = vpop.permute.xlu1 %3281  ;;  %v2324_v62 = vpack.c.bf16 %v1354_v15, %v1311_v60 }
 0x148   : > { %v5051_v25 = vunpack.i.h.bf16 %v4387_v41  ;;  %v3283_v63 = vunpack.i.l.bf16 %v4387_v41  ;;  %v3298_v56 = vunpack.i.l.bf16 %v4385_v57 }
 0x149   : > { %3511 = vrot.lane.b32.xlu0 %v4052_v18, %s3698_s20  ;;  %3506 = vrot.lane.b32.xlu1 %v4052_v18, %s3697_s19 }
 0x14a   : > { %v4406_v11 = vsel %vm5052_vm6, %v3283_v63, %v5051_v25  ;;  %2454 = vmatpush1.bf16.msra.mxu0 %v2324_v62  ;;  %v1357_v44 = vsel %vm5052_vm6, %v3274_v0, %v3283_v63  ;;  %v1313_v25 = vsel %vm5059_vm9, %v3259_v34, %v3269_v30  ;;  %v5109_v62 = vunpack.i.h.bf16 %v4374_v4 }
 0x14b   : > { %v4410_v60 = vpop.permute.xlu0 %3306  ;;  %v3292_v15 = vpop.permute.xlu1 %3291  ;;  %v2327_v32 = vpack.c.bf16 %v1357_v44, %v1314_v53  ;;  %v2326_v63 = vpack.c.bf16 %v1356_v1, %v1313_v25  ;;  %vm1482_vm6 = vcmask 7168   ;;  %vm3718_vm9 = vmmov 1  }
 0x14c   : > { %v3294_v45 = vunpack.i.h.bf16 %v3292_v15  ;;  %v3293_v58 = vunpack.i.l.bf16 %v3292_v15  ;;  %v1398_v0 = vsel %vm5065_vm4, %v3288_v31, %v5109_v62  ;;  %v3308_v25 = vunpack.i.l.bf16 %v4410_v60  ;;  %vm3056_vm3 = vmpackc.low %vm3927_vm8, %vm3718_vm9 }
 0x14d   : > { %1222 = vrot.lane.b32.xlu0 %v4308_v23, %s3698_s20  ;;  %1179 = vrot.lane.b32.xlu1 %v4308_v23, %s3697_s19  ;;  %vm1577_vm8 = vcmask 973824   ;;  %s5118_s19 = smov 119   ;;  %s5119_s20 = smov 39  }
 0x14e   : > { %2494 = vmatprep.subr.bf16.mxu1 %v2327_v32  ;;  %v1441_v53 = vsel %vm5064_vm5, %v3293_v58, %v3294_v45 }
 0x14f   : > { %2495 = vmatpush1.bf16.msra.mxu1 %v2326_v63  ;;  %v3317_v27 = vpop.permute.xlu0 %3316  ;;  %v3302_v34 = vpop.permute.xlu1 %3301  ;;  %v2333_v30 = vpack.c.bf16 %v1441_v53, %v1398_v0  ;;  %v1397_v63 = vsel %vm5065_vm4, %v3298_v56, %v3288_v31  ;;  %v3299_v0 = vunpack.i.h.bf16 %v4385_v57 }
 0x150   : > { %v3319_v44 = vunpack.i.h.bf16 %v3317_v27  ;;  %v3318_v15 = vunpack.i.l.bf16 %v3317_v27  ;;  %v3303_v21 = vunpack.i.l.bf16 %v3302_v34  ;;  %v3304_v1 = vunpack.i.h.bf16 %v3302_v34 }
 0x151   : > { %3521 = vrot.lane.b32.xlu0 %v4052_v18, %s3700_s26  ;;  %3516 = vrot.lane.b32.xlu1 %v4052_v18, %s5110_s29 }
 0x152   : > { %v1484_v32 = vsel %vm1482_vm6, %v3318_v15, %v3319_v44  ;;  %2455 = vmatprep.subr.bf16.mxu0 %v2333_v30  ;;  %v1440_v62 = vsel %vm5064_vm5, %v3303_v21, %v3293_v58  ;;  %v1400_v58 = vsel %vm5065_vm4, %v3299_v0, %v3308_v25  ;;  %v1442_v56 = vsel %vm5064_vm5, %v3294_v45, %v3304_v1 }
 0x153   : > { %v3057_v53 = vpack.c.bf16 %v3937_v37, %v1484_v32  ;;  %v4437_v27 = vpop.permute.xlu0 %3326  ;;  %v4439_v55 = vpop.permute.xlu1 %3311  ;;  %v2332_v7 = vpack.c.bf16 %v1440_v62, %v1397_v63  ;;  %v5111_v37 = vunpack.i.h.bf16 %v4410_v60 }
 0x154   : > { %v5061_v10 = vunpack.i.h.bf16 %v4437_v27  ;;  %v3328_v14 = vunpack.i.l.bf16 %v4437_v27  ;;  %v5063_v34 = vunpack.i.h.bf16 %v4439_v55  ;;  %v3313_v30 = vunpack.i.l.bf16 %v4439_v55 }
 0x155   : > { %v4451_v57 = vsel %vm5065_vm4, %v3308_v25, %v5111_v37  ;;  %1308 = vrot.lane.b32.xlu0 %v4308_v23, %s3700_s26  ;;  %1265 = vrot.lane.b32.xlu1 %v4308_v23, %s5110_s29  ;;  %s5120_s26 = smov 117   ;;  %s5124_s29 = smov 28  }
 0x156   : > { %v4461_v31 = vsel %vm1482_vm6, %v3328_v14, %v5061_v10  ;;  %v4466_v33 = vsel %vm5064_vm5, %v3313_v30, %v5063_v34  ;;  %2456 = vmatpush1.bf16.msra.mxu0 %v2332_v7  ;;  %v1443_v21 = vsel %vm5064_vm5, %v3304_v1, %v3313_v30  ;;  %v1399_v34 = vsel %vm5065_vm4, %v5112_v29, %v3299_v0  ;;  %vm3062_vm5 = vmpackc.low %vm3961_vm11, %vm3718_vm9 }
 0x157   : > { %3058 = vmatprep.subr.msk.bf16.mxu0 %vm3056_vm3, %v3057_v53  ;;  %v4472_v25 = vpop.permute.xlu0 %3336  ;;  %v3322_v63 = vpop.permute.xlu1 %3321  ;;  %v2335_v62 = vpack.c.bf16 %v1443_v21, %v1400_v58  ;;  %v2334_v45 = vpack.c.bf16 %v1442_v56, %v1399_v34  ;;  %vm3059_vm3 = vmpackc.low %vm3918_vm7, %vm3718_vm9  ;;  %vm1534_vm4 = vcmask 1039360   ;;  %vm1620_vm11 = vcmask 965632  }
 0x158   : > { %v3324_v37 = vunpack.i.h.bf16 %v3322_v63  ;;  %v3323_v10 = vunpack.i.l.bf16 %v3322_v63  ;;  %v3339_v7 = vunpack.i.h.bf16 %v4472_v25  ;;  %v3338_v1 = vunpack.i.l.bf16 %v4472_v25  ;;  %vm3065_vm7 = vmpackc.low %vm3957_vm10, %vm3718_vm9 }
 0x159   : > { %3531 = vrot.lane.b32.xlu0 %v4052_v18, %s3702_s27  ;;  %3526 = vrot.lane.b32.xlu1 %v4052_v18, %s5113_s28  ;;  %vm5070_vm10 = vcmask 957440  }
 0x15a   : > { %v1485_v53 = vsel %vm1482_vm6, %v3319_v44, %v3324_v37  ;;  %v1486_v30 = vsel %vm1482_vm6, %v3324_v37, %v3328_v14  ;;  %v1483_v4 = vsel %vm1482_vm6, %v3323_v10, %v3318_v15  ;;  %2496 = vmatprep.subr.bf16.mxu1 %v2335_v62 }
 0x15b   : > { %v3063_v29 = vpack.c.bf16 %v3946_v40, %v1486_v30  ;;  %v3066_v0 = vpack.c.bf16 %v3943_v39, %v1485_v53  ;;  %v3060_v34 = vpack.c.bf16 %v3934_v36, %v1483_v4  ;;  %2497 = vmatpush1.bf16.msra.mxu1 %v2334_v45  ;;  %v3347_v58 = vpop.permute.xlu0 %3346  ;;  %v3332_v21 = vpop.permute.xlu1 %3331  ;;  %v1579_v39 = vsel %vm1577_vm8, %v3338_v1, %v3339_v7 }
 0x15c   : > { %v3334_v10 = vunpack.i.h.bf16 %v3332_v21  ;;  %v3333_v14 = vunpack.i.l.bf16 %v3332_v21  ;;  %v3348_v28 = vunpack.i.l.bf16 %v3347_v58  ;;  %v3349_v53 = vunpack.i.h.bf16 %v3347_v58 }
 0x15d   : > { %1394 = vrot.lane.b32.xlu0 %v4308_v23, %s3702_s27  ;;  %1351 = vrot.lane.b32.xlu1 %v4308_v23, %s5113_s28  ;;  %s5122_s27 = smov 38   ;;  %s5125_s28 = smov 29  }
 0x15e   : > { %3061 = vmatpush1.bf16.msk.msra.mxu0 %vm3059_vm3, %v3060_v34  ;;  %3064 = vmatprep.subr.msk.bf16.mxu1 %vm3062_vm5, %v3063_v29  ;;  %v1536_v36 = vsel %vm1534_vm4, %v3333_v14, %v3334_v10  ;;  %v1578_v45 = vsel %vm1577_vm8, %v3348_v28, %v3338_v1  ;;  %v4527_v29 = vpack.i.bf16 %v4308_v23, %v4046_v17  ;;  %vm5071_vm5 = vcmask 310272  }
 0x15f   : > { %3067 = vmatpush1.bf16.msk.msra.mxu1 %vm3065_vm7, %v3066_v0  ;;  %v4506_v40 = vpop.permute.xlu0 %3356  ;;  %v3342_v47 = vpop.permute.xlu1 %3341  ;;  %v2349_v48 = vpack.c.bf16 %v1579_v39, %v1536_v36  ;;  %vm5072_vm3 = vcmask 318464   ;;  %vm5076_vm7 = vcmask 236544  }
 0x160   : > { %v5066_v44 = vunpack.i.h.bf16 %v4506_v40  ;;  %v3358_v15 = vunpack.i.l.bf16 %v4506_v40  ;;  %v3343_v56 = vunpack.i.l.bf16 %v3342_v47  ;;  %v3344_v63 = vunpack.i.h.bf16 %v3342_v47 }
 0x161   : > { %3541 = vrot.lane.b32.xlu0 %v4052_v18, %s5114_s13  ;;  %3536 = vrot.lane.b32.xlu1 %v4052_v18, %s5115_s14 }
 0x162   : > { %v4517_v62 = vsel %vm1577_vm8, %v3358_v15, %v5066_v44  ;;  %2459 = vmatprep.subr.bf16.mxu0 %v2349_v48  ;;  %v1535_v37 = vsel %vm1534_vm4, %v3343_v56, %v3333_v14  ;;  %v1581_v1 = vsel %vm1577_vm8, %v3349_v53, %v3358_v15  ;;  %v1537_v58 = vsel %vm1534_vm4, %v3334_v10, %v3344_v63 }
 0x163   : > { %v4521_v30 = vpop.permute.xlu0 %3366  ;;  %v4523_v4 = vpop.permute.xlu1 %3351  ;;  %v2348_v0 = vpack.c.bf16 %v1578_v45, %v1535_v37  ;;  %v1580_v37 = vsel %vm1577_vm8, %v3339_v7, %v3349_v53 }
 0x164   : > { %v5068_v34 = vunpack.i.h.bf16 %v4523_v4  ;;  %v3353_v21 = vunpack.i.l.bf16 %v4523_v4  ;;  %v3369_v14 = vunpack.i.h.bf16 %v4521_v30  ;;  %v3368_v17 = vunpack.i.l.bf16 %v4521_v30 }
 0x165   : > { %3546 = vrot.lane.b32.xlu0 %v4527_v29, %s5116_s16  ;;  %1437 = vrot.lane.b32.xlu1 %v4308_v23, %s5115_s14  ;;  %v5184_v51 = vunpack.i.h.bf16 %v4523_v4 }
 0x166   : > { %v4542_v28 = vsel %vm1534_vm4, %v3353_v21, %v5068_v34  ;;  %2460 = vmatpush1.bf16.msra.mxu0 %v2348_v0  ;;  %v1538_v36 = vsel %vm1534_vm4, %v3344_v63, %v3353_v21  ;;  %v2350_v63 = vpack.c.bf16 %v1580_v37, %v1537_v58  ;;  %v1665_v0 = vsel %vm5070_vm10, %v3368_v17, %v3369_v14 }
 0x167   : > { %v3377_v47 = vpop.permute.xlu0 %3376  ;;  %v3362_v48 = vpop.permute.xlu1 %3361  ;;  %v2351_v15 = vpack.c.bf16 %v1581_v1, %v1538_v36 }
 0x168   : > { %v3364_v10 = vunpack.i.h.bf16 %v3362_v48  ;;  %v3363_v56 = vunpack.i.l.bf16 %v3362_v48  ;;  %v3378_v45 = vunpack.i.l.bf16 %v3377_v47 }
 0x169   : > { %1532 = vrot.lane.b32.xlu0 %v3976_v54, %s5116_s16  ;;  %1480 = vrot.lane.b32.xlu1 %v4308_v23, %s5114_s13  ;;  %s5127_s13 = smov 27  }
 0x16a   : > { %2500 = vmatprep.subr.bf16.mxu1 %v2351_v15  ;;  %v1622_v30 = vsel %vm1620_vm11, %v3363_v56, %v3364_v10  ;;  %v1664_v37 = vsel %vm5070_vm10, %v3378_v45, %v3368_v17 }
 0x16b   : > { %2501 = vmatpush1.bf16.msra.mxu1 %v2350_v63  ;;  %v4556_v21 = vpop.permute.xlu0 %3386  ;;  %v3372_v1 = vpop.permute.xlu1 %3371  ;;  %v2357_v25 = vpack.c.bf16 %v1665_v0, %v1622_v30  ;;  %v3379_v63 = vunpack.i.h.bf16 %v3377_v47 }
 0x16c   : > { %v5067_v7 = vunpack.i.h.bf16 %v4556_v21  ;;  %v3388_v53 = vunpack.i.l.bf16 %v4556_v21  ;;  %v3373_v36 = vunpack.i.l.bf16 %v3372_v1  ;;  %v3374_v48 = vunpack.i.h.bf16 %v3372_v1 }
 0x16d   : > { %3556 = vrot.lane.b32.xlu0 %v4527_v29, %s5117_s17  ;;  %3551 = vrot.lane.b32.xlu1 %v4527_v29, %s5118_s19 }
 0x16e   : > { %v4567_v58 = vsel %vm5070_vm10, %v3388_v53, %v5067_v7  ;;  %2461 = vmatprep.subr.bf16.mxu0 %v2357_v25  ;;  %v1621_v15 = vsel %vm1620_vm11, %v3373_v36, %v3363_v56  ;;  %v1667_v25 = vsel %vm5070_vm10, %v3379_v63, %v3388_v53  ;;  %v1623_v56 = vsel %vm1620_vm11, %v3364_v10, %v3374_v48 }
 0x16f   : > { %v3397_v30 = vpop.permute.xlu0 %3396  ;;  %v4571_v0 = vpop.permute.xlu1 %3381  ;;  %v2356_v1 = vpack.c.bf16 %v1664_v37, %v1621_v15 }
 0x170   : > { %v5069_v39 = vunpack.i.h.bf16 %v4571_v0  ;;  %v3383_v44 = vunpack.i.l.bf16 %v4571_v0  ;;  %v3399_v17 = vunpack.i.h.bf16 %v3397_v30  ;;  %v3398_v47 = vunpack.i.l.bf16 %v3397_v30 }
 0x171   : > { %1618 = vrot.lane.b32.xlu0 %v3976_v54, %s5117_s17  ;;  %1575 = vrot.lane.b32.xlu1 %v3976_v54, %s5118_s19  ;;  %v1666_v30 = vsel %vm5070_vm10, %v3369_v14, %v3379_v63  ;;  %v4600_v14 = vpack.i.bf16 %v3976_v54, %v4308_v23  ;;  %vm5085_vm10 = vcmask 302080  }
 0x172   : > { %v4584_v45 = vsel %vm1620_vm11, %v3383_v44, %v5069_v39  ;;  %2462 = vmatpush1.bf16.msra.mxu0 %v2356_v1  ;;  %v1624_v36 = vsel %vm1620_vm11, %v3374_v48, %v3383_v44  ;;  %v2358_v1 = vpack.c.bf16 %v1666_v30, %v1623_v56  ;;  %v1751_v15 = vsel %vm5071_vm5, %v3398_v47, %v3399_v17 }
 0x173   : > { %v3407_v37 = vpop.permute.xlu0 %3406  ;;  %v3392_v7 = vpop.permute.xlu1 %3391  ;;  %v2359_v34 = vpack.c.bf16 %v1667_v25, %v1624_v36 }
 0x174   : > { %v3394_v53 = vunpack.i.h.bf16 %v3392_v7  ;;  %v3393_v10 = vunpack.i.l.bf16 %v3392_v7  ;;  %v3408_v44 = vunpack.i.l.bf16 %v3407_v37  ;;  %v3409_v32 = vunpack.i.h.bf16 %v3407_v37 }
 0x175   : > { %3566 = vrot.lane.b32.xlu0 %v4052_v18, %s5119_s20  ;;  %3561 = vrot.lane.b32.xlu1 %v4527_v29, %s5120_s26 }
 0x176   : > { %2502 = vmatprep.subr.bf16.mxu1 %v2359_v34  ;;  %v1708_v48 = vsel %vm5072_vm3, %v3393_v10, %v3394_v53  ;;  %v1750_v34 = vsel %vm5071_vm5, %v3408_v44, %v3398_v47 }
 0x177   : > { %2503 = vmatpush1.bf16.msra.mxu1 %v2358_v1  ;;  %v4596_v25 = vpop.permute.xlu0 %1739  ;;  %v3402_v36 = vpop.permute.xlu1 %3401  ;;  %v2365_v7 = vpack.c.bf16 %v1751_v15, %v1708_v48 }
 0x178   : > { %v3404_v63 = vunpack.i.h.bf16 %v3402_v36  ;;  %v3403_v39 = vunpack.i.l.bf16 %v3402_v36  ;;  %v1753_v37 = vsel %vm5071_vm5, %v3409_v32, %v4596_v25 }
 0x179   : > { %3576 = vrot.lane.b32.xlu0 %v4600_v14, %s5119_s20  ;;  %1661 = vrot.lane.b32.xlu1 %v3976_v54, %s5120_s26  ;;  %v1752_v54 = vsel %vm5071_vm5, %v3399_v17, %v3409_v32  ;;  %vm5079_vm5 = vcmask 220160  }
 0x17a   : > { %2463 = vmatprep.subr.bf16.mxu0 %v2365_v7  ;;  %v1707_v29 = vsel %vm5072_vm3, %v3403_v39, %v3393_v10  ;;  %v1709_v15 = vsel %vm5072_vm3, %v3394_v53, %v3404_v63 }
 0x17b   : > { %v3417_v56 = vpop.permute.xlu0 %3416  ;;  %v4608_v30 = vpop.permute.xlu1 %1696  ;;  %v2364_v23 = vpack.c.bf16 %v1750_v34, %v1707_v29  ;;  %v2366_v10 = vpack.c.bf16 %v1752_v54, %v1709_v15 }
 0x17c   : > { %v1710_v1 = vsel %vm5072_vm3, %v3404_v63, %v4608_v30  ;;  %v3419_v39 = vunpack.i.h.bf16 %v3417_v56  ;;  %v3418_v47 = vunpack.i.l.bf16 %v3417_v56  ;;  %vm5075_vm3 = vcmask 228352  }
 0x17d   : > { %v2367_v48 = vpack.c.bf16 %v1753_v37, %v1710_v1  ;;  %3586 = vrot.lane.b32.xlu0 %v4052_v18, %s5121_s22  ;;  %3571 = vrot.lane.b32.xlu1 %v4052_v18, %s5122_s27 }
 0x17e   : > { %2464 = vmatpush1.bf16.msra.mxu0 %v2364_v23  ;;  %v1837_v17 = vsel %vm5076_vm7, %v3418_v47, %v3419_v39 }
 0x17f   : > { %v3427_v53 = vpop.permute.xlu0 %3426  ;;  %v3412_v44 = vpop.permute.xlu1 %3411  ;;  %2504 = vmatprep.subr.bf16.mxu1 %v2367_v48 }
 0x180   : > { %v3414_v36 = vunpack.i.h.bf16 %v3412_v44  ;;  %v3413_v7 = vunpack.i.l.bf16 %v3412_v44  ;;  %2505 = vmatpush1.bf16.msra.mxu1 %v2366_v10  ;;  %v3428_v63 = vunpack.i.l.bf16 %v3427_v53  ;;  %v3429_v37 = vunpack.i.h.bf16 %v3427_v53 }
 0x181   : > { %3596 = vrot.lane.b32.xlu0 %v4600_v14, %s5121_s22  ;;  %3581 = vrot.lane.b32.xlu1 %v4600_v14, %s5122_s27 }
 0x182   : > { %v1794_v32 = vsel %vm5085_vm10, %v3413_v7, %v3414_v36  ;;  %v1836_v48 = vsel %vm5076_vm7, %v3428_v63, %v3418_v47  ;;  %v1838_v47 = vsel %vm5076_vm7, %v3419_v39, %v3429_v37 }
 0x183   : > { %v4626_v29 = vpop.permute.xlu0 %1825  ;;  %v3422_v34 = vpop.permute.xlu1 %3421  ;;  %v2373_v56 = vpack.c.bf16 %v1837_v17, %v1794_v32 }
 0x184   : > { %5123 = vst [vmem:[#allocation9_spill] sm:$0xff] %v4626_v29  ;;  %v3424_v23 = vunpack.i.h.bf16 %v3422_v34  ;;  %v3423_v15 = vunpack.i.l.bf16 %v3422_v34  ;;  %v1839_v53 = vsel %vm5076_vm7, %v3429_v37, %v4626_v29  ;;  %vm5084_vm7 = vcmask 154624  }
 0x185   : > { %3606 = vrot.lane.b32.xlu0 %v4052_v18, %s5124_s29  ;;  %3591 = vrot.lane.b32.xlu1 %v4052_v18, %s5125_s28 }
 0x186   : > { %2465 = vmatprep.subr.bf16.mxu0 %v2373_v56  ;;  %v1793_v1 = vsel %vm5085_vm10, %v3423_v15, %v3413_v7  ;;  %v1795_v32 = vsel %vm5085_vm10, %v3414_v36, %v3424_v23 }
 0x187   : > { %v3437_v54 = vpop.permute.xlu0 %3436  ;;  %v4634_v10 = vpop.permute.xlu1 %1782  ;;  %v2372_v44 = vpack.c.bf16 %v1836_v48, %v1793_v1  ;;  %v2374_v56 = vpack.c.bf16 %v1838_v47, %v1795_v32 }
 0x188   : > { %5126 = vst [vmem:[#allocation10_spill] sm:$0xff] %v4634_v10  ;;  %v1796_v17 = vsel %vm5085_vm10, %v3424_v23, %v4634_v10  ;;  %v3439_v7 = vunpack.i.h.bf16 %v3437_v54  ;;  %v3438_v63 = vunpack.i.l.bf16 %v3437_v54 }
 0x189   : > { %v2375_v34 = vpack.c.bf16 %v1839_v53, %v1796_v17  ;;  %3616 = vrot.lane.b32.xlu0 %v4600_v14, %s5124_s29  ;;  %3601 = vrot.lane.b32.xlu1 %v4600_v14, %s5125_s28 }
 0x18a   : > { %2466 = vmatpush1.bf16.msra.mxu0 %v2372_v44  ;;  %v1923_v37 = vsel %vm5079_vm5, %v3438_v63, %v3439_v7 }
 0x18b   : > { %v3447_v36 = vpop.permute.xlu0 %3446  ;;  %v3432_v15 = vpop.permute.xlu1 %3431  ;;  %2506 = vmatprep.subr.bf16.mxu1 %v2375_v34 }
 0x18c   : > { %v3434_v1 = vunpack.i.h.bf16 %v3432_v15  ;;  %v3433_v23 = vunpack.i.l.bf16 %v3432_v15  ;;  %2507 = vmatpush1.bf16.msra.mxu1 %v2374_v56  ;;  %v3448_v48 = vunpack.i.l.bf16 %v3447_v36  ;;  %v3449_v34 = vunpack.i.h.bf16 %v3447_v36 }
 0x18d   : > { %3626 = vrot.lane.b32.xlu0 %v4052_v18, %s3716_s30  ;;  %3611 = vrot.lane.b32.xlu1 %v4052_v18, %s5127_s13 }
 0x18e   : > { %v1880_v39 = vsel %vm5075_vm3, %v3433_v23, %v3434_v1  ;;  %v1922_v56 = vsel %vm5079_vm5, %v3448_v48, %v3438_v63  ;;  %v1924_v63 = vsel %vm5079_vm5, %v3439_v7, %v3449_v34 }
 0x18f   : > { %v4652_v54 = vpop.permute.xlu0 %1911  ;;  %v3442_v44 = vpop.permute.xlu1 %3441  ;;  %v2381_v32 = vpack.c.bf16 %v1923_v37, %v1880_v39 }
 0x190   : > { %5128 = vst [vmem:[#allocation11_spill] sm:$0xff] %v4652_v54  ;;  %v3444_v53 = vunpack.i.h.bf16 %v3442_v44  ;;  %v3443_v17 = vunpack.i.l.bf16 %v3442_v44  ;;  %v1925_v36 = vsel %vm5079_vm5, %v3449_v34, %v4652_v54  ;;  %vm5083_vm5 = vcmask 138240  }
 0x191   : > { %3636 = vrot.lane.b32.xlu0 %v4600_v14, %s3716_s30  ;;  %3621 = vrot.lane.b32.xlu1 %v4600_v14, %s5127_s13  ;;  %s5130_s30 = smov 18  }
 0x192   : > { %2467 = vmatprep.subr.bf16.mxu0 %v2381_v32  ;;  %v1879_v47 = vsel %vm5075_vm3, %v3443_v17, %v3433_v23  ;;  %v1881_v39 = vsel %vm5075_vm3, %v3434_v1, %v3444_v53  ;;  %v2404_v1 = vld [vmem:[%s4998_s7] sm:$0xff] }
 0x193   : > { %v3457_v15 = vpop.permute.xlu0 %3456  ;;  %v4660_v29 = vpop.permute.xlu1 %1868  ;;  %v2380_v10 = vpack.c.bf16 %v1922_v56, %v1879_v47  ;;  %v2382_v32 = vpack.c.bf16 %v1924_v63, %v1881_v39 }
 0x194   : > { %5129 = vst [vmem:[#allocation12_spill] sm:$0xff] %v4660_v29  ;;  %v1882_v37 = vsel %vm5075_vm3, %v3444_v53, %v4660_v29  ;;  %v3459_v23 = vunpack.i.h.bf16 %v3457_v15  ;;  %v3458_v48 = vunpack.i.l.bf16 %v3457_v15  ;;  %vm5081_vm3 = vcmask 146432  }
 0x195   : > { %v2383_v44 = vpack.c.bf16 %v1925_v36, %v1882_v37  ;;  %3646 = vrot.lane.b32.xlu0 %v4052_v18, %s3717_s21  ;;  %3631 = vrot.lane.b32.xlu1 %v4052_v18, %s5130_s30 }
 0x196   : > { %2468 = vmatpush1.bf16.msra.mxu0 %v2380_v10  ;;  %v2009_v7 = vsel %vm5081_vm3, %v3458_v48, %v3459_v23 }
 0x197   : > { %v3467_v17 = vpop.permute.xlu0 %3466  ;;  %v3452_v47 = vpop.permute.xlu1 %3451  ;;  %2508 = vmatprep.subr.bf16.mxu1 %v2383_v44 }
 0x198   : > { %v3454_v53 = vunpack.i.h.bf16 %v3452_v47  ;;  %v3453_v56 = vunpack.i.l.bf16 %v3452_v47  ;;  %2509 = vmatpush1.bf16.msra.mxu1 %v2382_v32  ;;  %v3468_v18 = vunpack.i.l.bf16 %v3467_v17  ;;  %v3469_v44 = vunpack.i.h.bf16 %v3467_v17 }
 0x199   : > { %2407 = vperm.xlu0 %3134, %v2404_v1   ;;  %3641 = vrot.lane.b32.xlu1 %v4600_v14, %s5130_s30 }
 0x19a   : > { %v1966_v10 = vsel %vm5084_vm7, %v3453_v56, %v3454_v53  ;;  %v2008_v32 = vsel %vm5081_vm3, %v3468_v18, %v3458_v48 }
 0x19b   : > { %v4679_v34 = vpop.permute.xlu0 %1997  ;;  %v3462_v15 = vpop.permute.xlu1 %3461  ;;  %v2389_v39 = vpack.c.bf16 %v2009_v7, %v1966_v10 }
 0x19c   : > { %5131 = vst [vmem:[#allocation13_spill] sm:$0xff] %v4679_v34  ;;  %v3464_v36 = vunpack.i.h.bf16 %v3462_v15  ;;  %v3463_v37 = vunpack.i.l.bf16 %v3462_v15  ;;  %v2011_v10 = vsel %vm5081_vm3, %v3469_v44, %v4679_v34 }
 0x19d   : > { %3651 = vrot.lane.b32.xlu1 %v4600_v14, %s3717_s21  ;;  %2469 = vmatprep.subr.bf16.mxu0 %v2389_v39  ;;  %v2010_v14 = vsel %vm5081_vm3, %v3459_v23, %v3469_v44  ;;  %vm5082_vm3 = vcmask 1043456   ;;  %s2992_s21 = sshll.u32 %s5253_s23, 3  ;;  %s5241_s23 = sshll.u32 %s3820_s15, 2 }
 0x19e   : > { %v1965_v63 = vsel %vm5084_vm7, %v3463_v37, %v3453_v56  ;;  %v1967_v29 = vsel %vm5084_vm7, %v3454_v53, %v3464_v36  ;;  %s4915_s20 = scalar_lea.vmem %s5003_s12, %s2992_s21  ;;  %s4936_s27 = scalar_lea.vmem %s5002_s11, %s5241_s23 }
 0x19f   : > { %v3477_v1 = vpop.permute.xlu0 %3476  ;;  %v4685_v47 = vpop.permute.xlu1 %1954  ;;  %v2388_v54 = vpack.c.bf16 %v2008_v32, %v1965_v63  ;;  %v2390_v15 = vpack.c.bf16 %v2010_v14, %v1967_v29 }
 0x1a0   : > { %v1968_v17 = vsel %vm5084_vm7, %v3464_v36, %v4685_v47  ;;  %v3479_v48 = vunpack.i.h.bf16 %v3477_v1  ;;  %v3478_v18 = vunpack.i.l.bf16 %v3477_v1  ;;  %v4700_v1 = vcombine.low %v4262_v26, %v4262_v26 }
 0x1a1   : > { %v2391_v7 = vpack.c.bf16 %v2011_v10, %v1968_v17  ;;  %2470 = vmatpush1.bf16.msra.mxu0 %v2388_v54 }
 0x1a2   : > { %v2053_v29 = vsel %vm5083_vm5, %v3478_v18, %v3479_v48 }
 0x1a3   : > { %v3487_v56 = vpop.permute.xlu0 %3486  ;;  %v3472_v39 = vpop.permute.xlu1 %3471  ;;  %2510 = vmatprep.subr.bf16.mxu1 %v2391_v7  ;;  %v5132_v7 = vunpack.i.h.bf16 %v4128_v24  ;;  %v5134_v24 = vpack.c.bf16 %v4167_v8, %v4155_v3 }
 0x1a4   : > { %v3474_v37 = vunpack.i.h.bf16 %v3472_v39  ;;  %v3473_v63 = vunpack.i.l.bf16 %v3472_v39  ;;  %2511 = vmatpush1.bf16.msra.mxu1 %v2390_v15  ;;  %v3488_v53 = vunpack.i.l.bf16 %v3487_v56  ;;  %v5133_v15 = vunpack.i.h.bf16 %v4148_v61 }
 0x1a5   : > { %v3489_v26 = vunpack.i.h.bf16 %v3487_v56 }
 0x1a6   : > { %v2052_v32 = vsel %vm5083_vm5, %v3474_v37, %v3478_v18  ;;  %v2051_v34 = vsel %vm5083_vm5, %v3473_v63, %v3474_v37 }
 0x1a7   : > { %v2397_v36 = vpack.c.bf16 %v2052_v32, %v2052_v32  ;;  %v965_v10 = vpop.permute.xlu0 %964  ;;  %v3482_v54 = vpop.permute.xlu1 %3481  ;;  %v2396_v17 = vpack.c.bf16 %v2051_v34, %v2051_v34  ;;  %v1015_v34 = vsel %vm1009_vm1, %v5133_v15, %v3488_v53  ;;  %v2398_v32 = vpack.c.bf16 %v2053_v29, %v2053_v29 }
 0x1a8   : > { %v3483_v23 = vunpack.i.l.bf16 %v3482_v54  ;;  %v3484_v39 = vunpack.i.h.bf16 %v3482_v54 }
 0x1a9   : > { %3008 = vmatprep.subr.msk.bf16.mxu0 %vm5082_vm3, %v2397_v36  ;;  %v2422_v44 = vsel %vm5082_vm3, %v2396_v17, 0 }
 0x1aa   : > { %2472 = vmatpush1.bf16.msra.mxu0 %v2422_v44  ;;  %v972_v14 = vsel %vm966_vm2, %v5132_v7, %v3483_v23  ;;  %v973_v61 = vsel %vm966_vm2, %v3483_v23, %v3484_v39  ;;  %v974_v56 = vsel %vm966_vm2, %v3484_v39, %v965_v10  ;;  %v1016_v7 = vsel %vm1009_vm1, %v3488_v53, %v3489_v26 }
 0x1ab   : > { %v3492_v37 = vpop.permute.xlu0 %3491  ;;  %v4708_v18 = vpop.permute.xlu1 %2040  ;;  %v2297_v63 = vpack.c.bf16 %v1015_v34, %v972_v14  ;;  %v2298_v8 = vpack.c.bf16 %v1016_v7, %v973_v61  ;;  %v5135_v39 = vunpack.i.h.bf16 %v4171_v20  ;;  %vm5136_vm2 = vcmask 891904  }
 0x1ac   : > { %v2054_v36 = vsel %vm5083_vm5, %v3479_v48, %v4708_v18  ;;  %v2428_v48 = vsel %vm5082_vm3, %v2398_v32, 0  ;;  %v3493_v14 = vunpack.i.l.bf16 %v3492_v37  ;;  %v3494_v10 = vunpack.i.h.bf16 %v3492_v37  ;;  %vm5140_vm5 = vmmov %vm5136_vm2 }
 0x1ad   : > { %v2399_v17 = vpack.c.bf16 %v2054_v36, %v2054_v36  ;;  %2478 = vmatmul.mubr.bf16.vlgmr.msra.gmra.mrb[0].mxu0 %v4700_v1  ;;  %2527 = vmatprep.subr.bf16.mxu0 %v2297_v63  ;;  %v5137_v53 = vunpack.i.h.bf16 %v4199_v19  ;;  %vm5142_vm10 = vmmov %vm5136_vm2  ;;  %v5143_v19 = vpack.c.bf16 %v4221_v35, %v4209_v6 }
 0x1ae   : > { %2528 = vmatpush1.bf16.msra.mxu0 %v5134_v24  ;;  %3013 = vmatprep.mubr.msk.bf16.mxu0 %vm2416_vm14, %v4271_v13  ;;  %v1058_v32 = vsel %vm5136_vm2, %v5135_v39, %v3493_v14 }
 0x1af   : > { %v1051_v54 = vpop.permute.xlu0 %1050  ;;  %v1008_v44 = vpop.permute.xlu1 %1007  ;;  %3010 = vmatprep.subr.msk.bf16.mxu1 %vm5082_vm3, %v2399_v17 }
 0x1b0   : > { %v1017_v29 = vsel %vm1009_vm1, %v3489_v26, %v1008_v44  ;;  %2513 = vmatpush1.bf16.msra.mxu1 %v2428_v48  ;;  %vm5138_vm1 = vcmask 826368   ;;  %v1060_v44 = vsel %vm5140_vm5, %v3494_v10, %v1051_v54  ;;  %v5144_v54 = vunpack.i.h.bf16 %v4225_v46 }
 0x1b1   : > { %v2299_v3 = vpack.c.bf16 %v1017_v29, %v974_v56  ;;  %vm5139_vm3 = vmmov %vm5138_vm1 }
 0x1b2   : > { %vm5141_vm7 = vmmov %vm5138_vm1 }
 0x1b3   : > { %v3502_v15 = vpop.permute.xlu0 %3501  ;;  %v3497_v34 = vpop.permute.xlu1 %3496  ;;  %2519 = vmatmul.mubr.bf16.vlgmr.msra.gmra.mrb[0].mxu1 %v4700_v1  ;;  %2568 = vmatprep.subr.bf16.mxu1 %v2299_v3 }
 0x1b4   : > { %v3499_v23 = vunpack.i.h.bf16 %v3497_v34  ;;  %v3498_v63 = vunpack.i.l.bf16 %v3497_v34  ;;  %2569 = vmatpush1.bf16.msra.mxu1 %v2298_v8  ;;  %3015 = vmatprep.mubr.msk.bf16.mxu1 %vm2416_vm14, %v4271_v13  ;;  %v1059_v13 = vsel %vm5142_vm10, %v3493_v14, %v3494_v10  ;;  %v3503_v20 = vunpack.i.l.bf16 %v3502_v15 }
 0x1b5   : > { %v3504_v34 = vunpack.i.h.bf16 %v3502_v15  ;;  %vm5145_vm14 = vcmask 818176   ;;  %v5146_v14 = vunpack.i.h.bf16 %v4267_v59  ;;  %vm5147_vm10 = vcmask 809984  }
 0x1b6   : > { %v1101_v36 = vsel %vm5138_vm1, %v5137_v53, %v3498_v63  ;;  %v1102_v26 = vsel %vm5139_vm3, %v3498_v63, %v3499_v23  ;;  %vm5148_vm5 = vmmov %vm5147_vm10  ;;  %v5152_v59 = vpack.c.bf16 %v4293_v5, %v4281_v16  ;;  %vm5154_vm1 = vcmask 744448  }
 0x1b7   : > { %v1137_v17 = vpop.permute.xlu0 %1136  ;;  %v1094_v24 = vpop.permute.xlu1 %1093  ;;  %v2305_v61 = vpack.c.bf16 %v1101_v36, %v1058_v32  ;;  %v2306_v56 = vpack.c.bf16 %v1102_v26, %v1059_v13  ;;  %vm5149_vm3 = vmmov %vm5145_vm14 }
 0x1b8   : > { %v1103_v48 = vsel %vm5141_vm7, %v3499_v23, %v1094_v24  ;;  %v1144_v23 = vsel %vm5145_vm14, %v5144_v54, %v3503_v20  ;;  %v1146_v32 = vsel %vm5149_vm3, %v3504_v34, %v1137_v17  ;;  %vm5150_vm7 = vmmov %vm5148_vm5  ;;  %v5153_v17 = vunpack.i.h.bf16 %v4297_v43 }
 0x1b9   : > { %v2307_v37 = vpack.c.bf16 %v1103_v48, %v1060_v44  ;;  %2529 = vmatprep.subr.bf16.mxu0 %v2305_v61  ;;  %vm5151_vm2 = vmmov %vm5149_vm3  ;;  %vm5156_vm14 = vcmask 736256  }
 0x1ba   : > { %2530 = vmatpush1.bf16.msra.mxu0 %v5143_v19  ;;  %v1145_v36 = vsel %vm5151_vm2, %v3503_v20, %v3504_v34  ;;  %v5155_v20 = vunpack.i.h.bf16 %v4335_v2  ;;  %v5161_v2 = vpack.c.bf16 %v4354_v52, %v4342_v50  ;;  %vm5163_vm2 = vcmask 728064  }
 0x1bb   : > { %v3512_v29 = vpop.permute.xlu0 %3511  ;;  %v3507_v7 = vpop.permute.xlu1 %3506  ;;  %2570 = vmatprep.subr.bf16.mxu1 %v2307_v37 }
 0x1bc   : > { %v3509_v3 = vunpack.i.h.bf16 %v3507_v7  ;;  %v3508_v8 = vunpack.i.l.bf16 %v3507_v7  ;;  %2571 = vmatpush1.bf16.msra.mxu1 %v2306_v56  ;;  %v3513_v46 = vunpack.i.l.bf16 %v3512_v29  ;;  %v3514_v13 = vunpack.i.h.bf16 %v3512_v29 }
 0x1be   : > { %v1187_v63 = vsel %vm5147_vm10, %v5146_v14, %v3508_v8  ;;  %v1188_v10 = vsel %vm5148_vm5, %v3508_v8, %v3509_v3  ;;  %v1230_v37 = vsel %vm5154_vm1, %v5153_v17, %v3513_v46  ;;  %vm5157_vm10 = vmmov %vm5156_vm14 }
 0x1bf   : > { %v1223_v39 = vpop.permute.xlu0 %1222  ;;  %v1180_v6 = vpop.permute.xlu1 %1179  ;;  %v2313_v35 = vpack.c.bf16 %v1187_v63, %v1144_v23  ;;  %v2314_v26 = vpack.c.bf16 %v1188_v10, %v1145_v36  ;;  %vm5158_vm5 = vmmov %vm5154_vm1 }
 0x1c0   : > { %v1189_v53 = vsel %vm5150_vm7, %v3509_v3, %v1180_v6  ;;  %v1232_v3 = vsel %vm5158_vm5, %v3514_v13, %v1223_v39  ;;  %vm5159_vm3 = vmmov %vm5157_vm10  ;;  %v5162_v39 = vunpack.i.h.bf16 %v4358_v38 }
 0x1c1   : > { %v2315_v15 = vpack.c.bf16 %v1189_v53, %v1146_v32  ;;  %2531 = vmatprep.subr.bf16.mxu0 %v2313_v35  ;;  %vm5160_vm7 = vmmov %vm5154_vm1  ;;  %v5164_v32 = vunpack.i.h.bf16 %v4387_v41  ;;  %vm5165_vm1 = vcmask 89088   ;;  %v5170_v41 = vpack.c.bf16 %v4406_v11, %v4394_v22 }
 0x1c2   : > { %2532 = vmatpush1.bf16.msra.mxu0 %v5152_v59  ;;  %v1231_v34 = vsel %vm5160_vm7, %v3513_v46, %v3514_v13  ;;  %vm5168_vm5 = vmmov %vm5165_vm1  ;;  %vm5173_vm7 = vcmask 80896  }
 0x1c3   : > { %v3522_v24 = vpop.permute.xlu0 %3521  ;;  %v3517_v61 = vpop.permute.xlu1 %3516  ;;  %2572 = vmatprep.subr.bf16.mxu1 %v2315_v15 }
 0x1c4   : > { %v3519_v44 = vunpack.i.h.bf16 %v3517_v61  ;;  %v3518_v48 = vunpack.i.l.bf16 %v3517_v61  ;;  %2573 = vmatpush1.bf16.msra.mxu1 %v2314_v26  ;;  %v3523_v43 = vunpack.i.l.bf16 %v3522_v24  ;;  %v3524_v6 = vunpack.i.h.bf16 %v3522_v24 }
 0x1c6   : > { %v1273_v56 = vsel %vm5156_vm14, %v5155_v20, %v3518_v48  ;;  %v1274_v19 = vsel %vm5157_vm10, %v3518_v48, %v3519_v44  ;;  %v1316_v35 = vsel %vm5163_vm2, %v5162_v39, %v3523_v43  ;;  %vm5166_vm14 = vmmov %vm5165_vm1  ;;  %v5183_v39 = vld [vmem:[#allocation6_spill] sm:$0xff] }
 0x1c7   : > { %v1309_v7 = vpop.permute.xlu0 %1308  ;;  %v1266_v16 = vpop.permute.xlu1 %1265  ;;  %v2321_v5 = vpack.c.bf16 %v1273_v56, %v1230_v37  ;;  %v2322_v54 = vpack.c.bf16 %v1274_v19, %v1231_v34  ;;  %vm5167_vm10 = vmmov %vm5163_vm2  ;;  %v5171_v56 = vunpack.i.h.bf16 %v4437_v27 }
 0x1c8   : > { %v1275_v8 = vsel %vm5159_vm3, %v3519_v44, %v1266_v16  ;;  %v1318_v46 = vsel %vm5167_vm10, %v3524_v6, %v1309_v7  ;;  %vm5169_vm3 = vmmov %vm5163_vm2  ;;  %v5172_v7 = vunpack.i.h.bf16 %v4410_v60  ;;  %vm5175_vm2 = vcmask 72704  }
 0x1c9   : > { %v2323_v29 = vpack.c.bf16 %v1275_v8, %v1232_v3  ;;  %2533 = vmatprep.subr.bf16.mxu0 %v2321_v5  ;;  %v1317_v59 = vsel %vm5169_vm3, %v3523_v43, %v3524_v6  ;;  %v5174_v5 = vunpack.i.h.bf16 %v4439_v55  ;;  %vm5179_vm3 = vmmov %vm5173_vm7 }
 0x1ca   : > { %2534 = vmatpush1.bf16.msra.mxu0 %v5161_v2 }
 0x1cb   : > { %v3532_v23 = vpop.permute.xlu0 %3531  ;;  %v3527_v14 = vpop.permute.xlu1 %3526  ;;  %2574 = vmatprep.subr.bf16.mxu1 %v2323_v29 }
 0x1cc   : > { %v3529_v63 = vunpack.i.h.bf16 %v3527_v14  ;;  %v3528_v10 = vunpack.i.l.bf16 %v3527_v14  ;;  %2575 = vmatpush1.bf16.msra.mxu1 %v2322_v54  ;;  %v3533_v38 = vunpack.i.l.bf16 %v3532_v23  ;;  %v3534_v20 = vunpack.i.h.bf16 %v3532_v23 }
 0x1cd   : > { %v5180_v23 = vpack.c.bf16 %v4466_v33, %v4451_v57  ;;  %v5181_v57 = vld [vmem:[#allocation8_spill] sm:$0xff] }
 0x1ce   : > { %v1359_v53 = vsel %vm5165_vm1, %v5164_v32, %v3528_v10  ;;  %v1360_v36 = vsel %vm5166_vm14, %v3528_v10, %v3529_v63  ;;  %v1402_v16 = vsel %vm5173_vm7, %v5172_v7, %v3533_v38  ;;  %vm5176_vm1 = vmmov %vm5175_vm2  ;;  %v1403_v60 = vsel %vm5179_vm3, %v3533_v38, %v3534_v20 }
 0x1cf   : > { %v1395_v15 = vpop.permute.xlu0 %1394  ;;  %v1352_v50 = vpop.permute.xlu1 %1351  ;;  %v2329_v52 = vpack.c.bf16 %v1359_v53, %v1316_v35  ;;  %v2330_v61 = vpack.c.bf16 %v1360_v36, %v1317_v59  ;;  %vm5177_vm14 = vmmov %vm5173_vm7  ;;  %vm5202_vm3 = vcmask 302080  }
 0x1d0   : > { %v1361_v26 = vsel %vm5168_vm5, %v3529_v63, %v1352_v50  ;;  %v1404_v43 = vsel %vm5177_vm14, %v3534_v20, %v1395_v15  ;;  %vm5178_vm10 = vmmov %vm5176_vm1  ;;  %v5185_v50 = vunpack.i.h.bf16 %v4506_v40  ;;  %v5186_v40 = vpack.c.bf16 %v4517_v62, %v4542_v28 }
 0x1d1   : > { %v2331_v24 = vpack.c.bf16 %v1361_v26, %v1318_v46  ;;  %2535 = vmatprep.subr.bf16.mxu0 %v2329_v52  ;;  %vm3068_vm5 = vmpackc.low %vm4025_vm15, %vm3718_vm9 }
 0x1d2   : > { %2536 = vmatpush1.bf16.msra.mxu0 %v5170_v41  ;;  %vm3071_vm15 = vmpackc.low %vm3965_vm12, %vm3718_vm9  ;;  %vm5189_vm12 = vcmask 957440  }
 0x1d3   : > { %v3542_v44 = vpop.permute.xlu0 %3541  ;;  %v3537_v48 = vpop.permute.xlu1 %3536  ;;  %2576 = vmatprep.subr.bf16.mxu1 %v2331_v24  ;;  %vm3074_vm7 = vmpackc.low %vm4244_vm13, %vm3718_vm9 }
 0x1d4   : > { %v3543_v13 = vunpack.i.l.bf16 %v3542_v44  ;;  %v3539_v17 = vunpack.i.h.bf16 %v3537_v48  ;;  %v3538_v37 = vunpack.i.l.bf16 %v3537_v48  ;;  %2577 = vmatpush1.bf16.msra.mxu1 %v2330_v61  ;;  %v3544_v11 = vunpack.i.h.bf16 %v3542_v44 }
 0x1d6   : > { %v1488_v19 = vsel %vm1482_vm6, %v5171_v56, %v3543_v13  ;;  %v1445_v22 = vsel %vm5175_vm2, %v5174_v5, %v3538_v37  ;;  %v1446_v3 = vsel %vm5176_vm1, %v3538_v37, %v3539_v17  ;;  %v1489_v14 = vsel %vm1482_vm6, %v3543_v13, %v3544_v11  ;;  %vm3077_vm2 = vmpackc.low %vm4031_vm0, %vm3718_vm9 }
 0x1d7   : > { %v3547_v8 = vpop.permute.xlu0 %3546  ;;  %v1438_v34 = vpop.permute.xlu1 %1437  ;;  %v2337_v29 = vpack.c.bf16 %v1445_v22, %v1402_v16  ;;  %v3069_v55 = vpack.c.bf16 %v4014_v9, %v1488_v19  ;;  %v2338_v2 = vpack.c.bf16 %v1446_v3, %v1403_v60  ;;  %v3072_v9 = vpack.c.bf16 %v3949_v42, %v4461_v31  ;;  %vm5190_vm0 = vmmov %vm5189_vm12 }
 0x1d8   : > { %v1447_v27 = vsel %vm5178_vm10, %v3539_v17, %v1438_v34  ;;  %v3078_v35 = vpack.c.bf16 %v5183_v39, %v1489_v14  ;;  %v3548_v49 = vunpack.i.l.bf16 %v3547_v8  ;;  %v3549_v36 = vunpack.i.h.bf16 %v3547_v8 }
 0x1d9   : > { %v2339_v54 = vpack.c.bf16 %v1447_v27, %v1404_v43  ;;  %2537 = vmatprep.subr.bf16.mxu0 %v2337_v29  ;;  %v5187_v19 = vunpack.i.h.bf16 %v4571_v0  ;;  %v5188_v16 = vunpack.i.h.bf16 %v4556_v21  ;;  %v5192_v21 = vpack.c.bf16 %v4567_v58, %v4584_v45 }
 0x1da   : > { %2538 = vmatpush1.bf16.msra.mxu0 %v5180_v23  ;;  %v1540_v15 = vsel %vm1534_vm4, %v5184_v51, %v3548_v49  ;;  %v1541_v41 = vsel %vm1534_vm4, %v3548_v49, %v3549_v36  ;;  %vm5193_vm9 = vcmask 318464  }
 0x1db   : > { %v1533_v63 = vpop.permute.xlu0 %1532  ;;  %v1481_v10 = vpop.permute.xlu1 %1480  ;;  %3070 = vmatprep.subr.msk.bf16.mxu0 %vm3068_vm5, %v3069_v55  ;;  %2578 = vmatprep.subr.bf16.mxu1 %v2339_v54  ;;  %vm5194_vm13 = vmmov %vm5193_vm9 }
 0x1dc   : > { %v1490_v12 = vsel %vm1482_vm6, %v3544_v11, %v1481_v10  ;;  %2579 = vmatpush1.bf16.msra.mxu1 %v2338_v2  ;;  %v1542_v38 = vsel %vm1534_vm4, %v3549_v36, %v1533_v63  ;;  %vm5191_vm4 = vmmov %vm5190_vm0 }
 0x1dd   : > { %v3075_v33 = vpack.c.bf16 %v5181_v57, %v1490_v12  ;;  %vm5197_vm1 = vmmov %vm5193_vm9 }
 0x1de   : > { %3073 = vmatpush1.bf16.msk.msra.mxu0 %vm3071_vm15, %v3072_v9  ;;  %vm5199_vm10 = vmmov %vm5197_vm1 }
 0x1df   : > { %v3557_v32 = vpop.permute.xlu0 %3556  ;;  %v3552_v53 = vpop.permute.xlu1 %3551  ;;  %3076 = vmatprep.subr.msk.bf16.mxu1 %vm3074_vm7, %v3075_v33  ;;  %vm5203_vm15 = vmmov %vm5202_vm3  ;;  %vm5205_vm7 = vcmask 236544  }
 0x1e0   : > { %v3554_v42 = vunpack.i.h.bf16 %v3552_v53  ;;  %v3553_v31 = vunpack.i.l.bf16 %v3552_v53  ;;  %3079 = vmatpush1.bf16.msk.msra.mxu1 %vm3077_vm2, %v3078_v35  ;;  %v3558_v4 = vunpack.i.l.bf16 %v3557_v32  ;;  %v3559_v56 = vunpack.i.h.bf16 %v3557_v32  ;;  %vm5206_vm2 = vmmov %vm5205_vm7 }
 0x1e2   : > { %v1583_v52 = vsel %vm1577_vm8, %v5185_v50, %v3553_v31  ;;  %v1584_v46 = vsel %vm1577_vm8, %v3553_v31, %v3554_v42  ;;  %v1626_v7 = vsel %vm1620_vm11, %v5187_v19, %v3558_v4  ;;  %v1627_v34 = vsel %vm1620_vm11, %v3558_v4, %v3559_v56 }
 0x1e3   : > { %v1619_v26 = vpop.permute.xlu0 %1618  ;;  %v1576_v59 = vpop.permute.xlu1 %1575  ;;  %v2353_v24 = vpack.c.bf16 %v1583_v52, %v1540_v15  ;;  %v2354_v48 = vpack.c.bf16 %v1584_v46, %v1541_v41  ;;  %v5201_v52 = vld [vmem:[#allocation10_spill] sm:$0xff] }
 0x1e4   : > { %v1585_v61 = vsel %vm1577_vm8, %v3554_v42, %v1576_v59  ;;  %v1628_v3 = vsel %vm1620_vm11, %v3559_v56, %v1619_v26  ;;  %vm5195_vm8 = vcmask 310272  }
 0x1e5   : > { %v2355_v44 = vpack.c.bf16 %v1585_v61, %v1542_v38  ;;  %2541 = vmatprep.subr.bf16.mxu0 %v2353_v24  ;;  %vm5196_vm11 = vmmov %vm5195_vm8  ;;  %v5204_v38 = vld [vmem:[#allocation9_spill] sm:$0xff] }
 0x1e6   : > { %2542 = vmatpush1.bf16.msra.mxu0 %v5186_v40  ;;  %vm5198_vm14 = vmmov %vm5195_vm8 }
 0x1e7   : > { %v3567_v13 = vpop.permute.xlu0 %3566  ;;  %v3562_v17 = vpop.permute.xlu1 %3561  ;;  %2582 = vmatprep.subr.bf16.mxu1 %v2355_v44  ;;  %vm5200_vm5 = vmmov %vm5195_vm8 }
 0x1e8   : > { %v3564_v37 = vunpack.i.h.bf16 %v3562_v17  ;;  %v3563_v20 = vunpack.i.l.bf16 %v3562_v17  ;;  %2583 = vmatpush1.bf16.msra.mxu1 %v2354_v48  ;;  %v3569_v29 = vunpack.i.h.bf16 %v3567_v13  ;;  %v3568_v43 = vunpack.i.l.bf16 %v3567_v13 }
 0x1ea   : > { %v1669_v5 = vsel %vm5189_vm12, %v5188_v16, %v3563_v20  ;;  %v1670_v22 = vsel %vm5190_vm0, %v3563_v20, %v3564_v37  ;;  %v1711_v23 = vsel %vm5193_vm9, %v4608_v30, %v3568_v43  ;;  %v1712_v14 = vsel %vm5194_vm13, %v3568_v43, %v3569_v29  ;;  %vm5207_vm12 = vmmov %vm5202_vm3 }
 0x1eb   : > { %v3577_v11 = vpop.permute.xlu0 %3576  ;;  %v1662_v62 = vpop.permute.xlu1 %1661  ;;  %v2361_v28 = vpack.c.bf16 %v1669_v5, %v1626_v7  ;;  %v2362_v27 = vpack.c.bf16 %v1670_v22, %v1627_v34  ;;  %vm5208_vm0 = vmmov %vm5206_vm2  ;;  %vm5212_vm13 = vcmask 228352  }
 0x1ec   : > { %v1671_v8 = vsel %vm5191_vm4, %v3564_v37, %v1662_v62  ;;  %v3579_v63 = vunpack.i.h.bf16 %v3577_v11  ;;  %v3578_v10 = vunpack.i.l.bf16 %v3577_v11  ;;  %vm5209_vm4 = vmmov %vm5202_vm3 }
 0x1ed   : > { %v2363_v0 = vpack.c.bf16 %v1671_v8, %v1628_v3  ;;  %2543 = vmatprep.subr.bf16.mxu0 %v2361_v28  ;;  %vm5210_vm9 = vmmov %vm5208_vm0  ;;  %v5211_v8 = vld [vmem:[#allocation12_spill] sm:$0xff] }
 0x1ee   : > { %2544 = vmatpush1.bf16.msra.mxu0 %v5192_v21  ;;  %v1713_v30 = vsel %vm5197_vm1, %v3569_v29, %v3578_v10  ;;  %v1714_v53 = vsel %vm5199_vm10, %v3578_v10, %v3579_v63 }
 0x1ef   : > { %v3587_v60 = vpop.permute.xlu0 %3586  ;;  %v3572_v55 = vpop.permute.xlu1 %3571  ;;  %2584 = vmatprep.subr.bf16.mxu1 %v2363_v0 }
 0x1f0   : > { %v3574_v54 = vunpack.i.h.bf16 %v3572_v55  ;;  %v3573_v2 = vunpack.i.l.bf16 %v3572_v55  ;;  %2585 = vmatpush1.bf16.msra.mxu1 %v2362_v27  ;;  %v3589_v35 = vunpack.i.h.bf16 %v3587_v60  ;;  %v3588_v49 = vunpack.i.l.bf16 %v3587_v60  ;;  %v5214_v27 = vld [vmem:[#allocation11_spill] sm:$0xff] }
 0x1f2   : > { %v1754_v9 = vsel %vm5195_vm8, %v4596_v25, %v3573_v2  ;;  %v1755_v12 = vsel %vm5196_vm11, %v3573_v2, %v3574_v54  ;;  %v1797_v46 = vsel %vm5202_vm3, %v5201_v52, %v3588_v49  ;;  %v1798_v26 = vsel %vm5203_vm15, %v3588_v49, %v3589_v35  ;;  %vm5213_vm8 = vmmov %vm5212_vm13 }
 0x1f3   : > { %v2368_v58 = vpack.c.bf16 %v1754_v9, %v1711_v23  ;;  %v3597_v45 = vpop.permute.xlu0 %3596  ;;  %v3582_v57 = vpop.permute.xlu1 %3581  ;;  %v2369_v33 = vpack.c.bf16 %v1755_v12, %v1712_v14  ;;  %vm5215_vm11 = vcmask 220160   ;;  %vm5221_vm15 = vcmask 154624  }
 0x1f4   : > { %v3584_v6 = vunpack.i.h.bf16 %v3582_v57  ;;  %v3583_v39 = vunpack.i.l.bf16 %v3582_v57  ;;  %v3599_v59 = vunpack.i.h.bf16 %v3597_v45  ;;  %v3598_v24 = vunpack.i.l.bf16 %v3597_v45  ;;  %vm5216_vm1 = vmmov %vm5215_vm11 }
 0x1f5   : > { %2545 = vmatprep.subr.bf16.mxu0 %v2369_v33  ;;  %vm5218_vm10 = vmmov %vm5216_vm1 }
 0x1f6   : > { %v1756_v32 = vsel %vm5198_vm14, %v3574_v54, %v3583_v39  ;;  %2546 = vmatpush1.bf16.msra.mxu0 %v2368_v58  ;;  %v1757_v25 = vsel %vm5200_vm5, %v3583_v39, %v3584_v6  ;;  %v1799_v56 = vsel %vm5207_vm12, %v3589_v35, %v3598_v24  ;;  %v1800_v7 = vsel %vm5209_vm4, %v3598_v24, %v3599_v59  ;;  %vm5217_vm14 = vmmov %vm5213_vm8 }
 0x1f7   : > { %v2370_v42 = vpack.c.bf16 %v1756_v32, %v1713_v30  ;;  %v3607_v31 = vpop.permute.xlu0 %3606  ;;  %v3592_v36 = vpop.permute.xlu1 %3591  ;;  %v2371_v51 = vpack.c.bf16 %v1757_v25, %v1714_v53  ;;  %vm5219_vm5 = vmmov %vm5213_vm8  ;;  %vm5225_vm12 = vcmask 146432  }
 0x1f8   : > { %v3594_v15 = vunpack.i.h.bf16 %v3592_v36  ;;  %v3593_v50 = vunpack.i.l.bf16 %v3592_v36  ;;  %v3609_v37 = vunpack.i.h.bf16 %v3607_v31  ;;  %v3608_v20 = vunpack.i.l.bf16 %v3607_v31  ;;  %vm5220_vm3 = vmmov %vm5216_vm1 }
 0x1f9   : > { %2586 = vmatprep.subr.bf16.mxu1 %v2371_v51 }
 0x1fa   : > { %v1840_v61 = vsel %vm5205_vm7, %v5204_v38, %v3593_v50  ;;  %2587 = vmatpush1.bf16.msra.mxu1 %v2370_v42  ;;  %v1841_v41 = vsel %vm5206_vm2, %v3593_v50, %v3594_v15  ;;  %v1883_v34 = vsel %vm5212_vm13, %v5211_v8, %v3608_v20  ;;  %v1884_v29 = vsel %vm5213_vm8, %v3608_v20, %v3609_v37  ;;  %vm5222_vm7 = vmmov %vm5221_vm15 }
 0x1fb   : > { %v2376_v44 = vpack.c.bf16 %v1840_v61, %v1797_v46  ;;  %v3617_v4 = vpop.permute.xlu0 %3616  ;;  %v3602_v48 = vpop.permute.xlu1 %3601  ;;  %v2377_v40 = vpack.c.bf16 %v1841_v41, %v1798_v26  ;;  %vm5223_vm2 = vcmask 138240   ;;  %vm5230_vm8 = vmmov %vm5222_vm7 }
 0x1fc   : > { %v3604_v13 = vunpack.i.h.bf16 %v3602_v48  ;;  %v3603_v17 = vunpack.i.l.bf16 %v3602_v48  ;;  %v3619_v43 = vunpack.i.h.bf16 %v3617_v4  ;;  %v3618_v0 = vunpack.i.l.bf16 %v3617_v4  ;;  %vm5227_vm4 = vmmov %vm5223_vm2 }
 0x1fd   : > { %2547 = vmatprep.subr.bf16.mxu0 %v2377_v40 }
 0x1fe   : > { %v1842_v19 = vsel %vm5208_vm0, %v3594_v15, %v3603_v17  ;;  %2548 = vmatpush1.bf16.msra.mxu0 %v2376_v44  ;;  %v1843_v16 = vsel %vm5210_vm9, %v3603_v17, %v3604_v13  ;;  %v1885_v12 = vsel %vm5217_vm14, %v3609_v37, %v3618_v0  ;;  %v1886_v45 = vsel %vm5219_vm5, %v3618_v0, %v3619_v43  ;;  %v5224_v15 = vld [vmem:[#allocation13_spill] sm:$0xff]  ;;  %vm5226_vm0 = vmmov %vm5225_vm12 }
 0x1ff   : > { %v2378_v5 = vpack.c.bf16 %v1842_v19, %v1799_v56  ;;  %v3627_v22 = vpop.permute.xlu0 %3626  ;;  %v3612_v11 = vpop.permute.xlu1 %3611  ;;  %v2379_v62 = vpack.c.bf16 %v1843_v16, %v1800_v7  ;;  %vm5228_vm9 = vmmov %vm5222_vm7  ;;  %v5240_v43 = vld [vmem:[#allocation5_spill] sm:$0xff] }
 0x200   : > { %v3614_v28 = vunpack.i.h.bf16 %v3612_v11  ;;  %v3613_v3 = vunpack.i.l.bf16 %v3612_v11  ;;  %v3629_v10 = vunpack.i.h.bf16 %v3627_v22  ;;  %v3628_v9 = vunpack.i.l.bf16 %v3627_v22  ;;  %vm5229_vm13 = vmmov %vm5226_vm0  ;;  %v2635_v11 = vld [vmem:[%s3828_s18] sm:$0xff]  ;;  %s2609_s18 = sld [smem:[#allocation3]] }
 0x201   : > { %2588 = vmatprep.subr.bf16.mxu1 %v2379_v62  ;;  %vm5235_vm5 = vmmov %vm5223_vm2  ;;  %v5238_v62 = vmov 0  }
 0x202   : > { %v1926_v21 = vsel %vm5215_vm11, %v5214_v27, %v3613_v3  ;;  %2589 = vmatpush1.bf16.msra.mxu1 %v2378_v5  ;;  %v1927_v60 = vsel %vm5216_vm1, %v3613_v3, %v3614_v28  ;;  %v1969_v25 = vsel %vm5221_vm15, %v4685_v47, %v3628_v9  ;;  %v1970_v36 = vsel %vm5222_vm7, %v3628_v9, %v3629_v10  ;;  %vm5231_vm11 = vmmov %vm5226_vm0 }
 0x203   : > { %v2384_v55 = vpack.c.bf16 %v1926_v21, %v1883_v34  ;;  %v3637_v54 = vpop.permute.xlu0 %3636  ;;  %v3622_v2 = vpop.permute.xlu1 %3621  ;;  %v2385_v23 = vpack.c.bf16 %v1927_v60, %v1884_v29  ;;  %vm5232_vm1 = vcmask 1043456   ;;  %vm2636_vm7 = vcmp.gt.bf16.partialorder %v2635_v11, 0  ;;  %v5239_v34 = vld [vmem:[#allocation4_spill] sm:$0xff] }
 0x204   : > { %v3624_v14 = vunpack.i.h.bf16 %v3622_v2  ;;  %v3623_v63 = vunpack.i.l.bf16 %v3622_v2  ;;  %v3639_v42 = vunpack.i.h.bf16 %v3637_v54  ;;  %v3638_v31 = vunpack.i.l.bf16 %v3637_v54  ;;  %vm5233_vm14 = vmmov %vm5232_vm1 }
 0x205   : > { %2549 = vmatprep.subr.bf16.mxu0 %v2385_v23  ;;  %vm5237_vm15 = vmmov %vm5232_vm1  ;;  %v2650_v29 = vsub.s32 2, %v5239_v34  ;;  %v2658_v21 = vsub.s32 6, %v5239_v34 }
 0x206   : > { %v1928_v58 = vsel %vm5218_vm10, %v3614_v28, %v3623_v63  ;;  %2550 = vmatpush1.bf16.msra.mxu0 %v2384_v55  ;;  %v1929_v57 = vsel %vm5220_vm3, %v3623_v63, %v3624_v14  ;;  %v1971_v44 = vsel %vm5228_vm9, %v3629_v10, %v3638_v31  ;;  %v1972_v48 = vsel %vm5230_vm8, %v3638_v31, %v3639_v42  ;;  %vm5234_vm10 = vmmov %vm5223_vm2 }
 0x207   : > { %v2386_v33 = vpack.c.bf16 %v1928_v58, %v1885_v12  ;;  %v3647_v6 = vpop.permute.xlu0 %3646  ;;  %v3632_v39 = vpop.permute.xlu1 %3631  ;;  %v2387_v35 = vpack.c.bf16 %v1929_v57, %v1886_v45  ;;  %vm5236_vm3 = vmmov %vm5232_vm1  ;;  %v4893_v28 = vsel %vm2636_vm7, 65537, %v5238_v62  ;;  %v4919_v10 = vstv %s2609_s18 }
 0x208   : > { %v3649_v49 = vunpack.i.h.bf16 %v3647_v6  ;;  %v3648_v30 = vunpack.i.l.bf16 %v3647_v6  ;;  %v3634_v32 = vunpack.i.h.bf16 %v3632_v39  ;;  %v3633_v53 = vunpack.i.l.bf16 %v3632_v39 }
 0x209   : > { %2590 = vmatprep.subr.bf16.mxu1 %v2387_v35  ;;  %v2638_v3 = vunpack.c.l.b16 %v4893_v28  ;;  %v3719_v12 = vmov 0.0  }
 0x20a   : > { %v2056_v51 = vsel %vm5223_vm2, %v3648_v30, %v3649_v49  ;;  %v2012_v50 = vsel %vm5225_vm12, %v5224_v15, %v3633_v53  ;;  %2591 = vmatpush1.bf16.msra.mxu1 %v2386_v33  ;;  %v2013_v52 = vsel %vm5226_vm0, %v3633_v53, %v3634_v32  ;;  %v2055_v46 = vsel %vm5227_vm4, %v4708_v18, %v3648_v30 }
 0x20b   : > { %v2392_v26 = vpack.c.bf16 %v2012_v50, %v1969_v25  ;;  %v3642_v59 = vpop.permute.xlu1 %3641  ;;  %v2393_v24 = vpack.c.bf16 %v2013_v52, %v1970_v36  ;;  %v2401_v61 = vpack.c.bf16 %v2056_v51, %v2056_v51  ;;  %v2400_v41 = vpack.c.bf16 %v2055_v46, %v2055_v46 }
 0x20c   : > { %v3644_v47 = vunpack.i.h.bf16 %v3642_v59  ;;  %v3643_v38 = vunpack.i.l.bf16 %v3642_v59  ;;  %vm2640_vm2 = vcmp.ne.s32.totalorder %v2638_v3, 0  ;;  %vm665_vm4 = vcmask 15360  }
 0x20d   : > { %2551 = vmatprep.subr.bf16.mxu0 %v2393_v24  ;;  %v2434_v56 = vsel %vm5233_vm14, %v2400_v41, 0  ;;  %v2642_v8 = vsel %vm2640_vm2, 1, %v5238_v62  ;;  %666 = vst.msk [vmem:[%s4915_s20] sm:$0xff] %vm665_vm4, %v3719_v12 }
 0x20e   : > { %v2014_v4 = vsel %vm5229_vm13, %v3634_v32, %v3643_v38  ;;  %2552 = vmatpush1.bf16.msra.mxu0 %v2392_v26  ;;  %v2015_v40 = vsel %vm5231_vm11, %v3643_v38, %v3644_v47  ;;  %v2647_v0 = vrot.slane %v2642_v8, %v5240_v43  ;;  %v2651_v27 = vrot.slane %v2642_v8, %v2650_v29 }
 0x20f   : > { %v2394_v13 = vpack.c.bf16 %v2014_v4, %v1971_v44  ;;  %v3652_v17 = vpop.permute.xlu1 %3651  ;;  %3012 = vmatprep.subr.msk.bf16.mxu0 %vm5232_vm1, %v2401_v61  ;;  %v2395_v18 = vpack.c.bf16 %v2015_v40, %v1972_v48  ;;  %v2659_v54 = vrot.slane %v2642_v8, %v2658_v21 }
 0x210   : > { %v3654_v37 = vunpack.i.h.bf16 %v3652_v17  ;;  %v3653_v20 = vunpack.i.l.bf16 %v3652_v17  ;;  %vm2676_vm12 = vcmp.ne.s32.totalorder %v2647_v0, 0  ;;  %vm2677_vm0 = vcmp.ne.s32.totalorder %v2651_v27, 0 }
 0x211   : > { %2592 = vmatprep.subr.bf16.mxu1 %v2395_v18  ;;  %v2684_v55 = vsel %vm2676_vm12, 1, %v5238_v62  ;;  %v2685_v2 = vsel %vm2677_vm0, 1, %v5238_v62  ;;  %vm2679_vm13 = vcmp.ne.s32.totalorder %v2659_v54, 0 }
 0x212   : > { %v2058_v19 = vsel %vm5234_vm10, %v3653_v20, %v3654_v37  ;;  %2554 = vmatpush1.bf16.msra.mxu0 %v2434_v56  ;;  %2593 = vmatpush1.bf16.msra.mxu1 %v2394_v13  ;;  %v2057_v7 = vsel %vm5235_vm5, %v3649_v49, %v3653_v20  ;;  %v2695_v23 = vrot.slane %v2684_v55, %v5240_v43  ;;  %v2687_v35 = vsel %vm2679_vm13, 1, %v5238_v62 }
 0x213   : > { %v2403_v16 = vpack.c.bf16 %v2058_v19, %v2058_v19  ;;  %v2402_v5 = vpack.c.bf16 %v2057_v7, %v2057_v7  ;;  %v2699_v9 = vrot.slane %v2685_v2, %v5240_v43  ;;  %v2707_v36 = vrot.slane %v2687_v35, %v5240_v43 }
 0x214   : > { %vm2724_vm11 = vcmp.eq.s32.totalorder %v2695_v23, 1 }
 0x215   : > { %2560 = vmatmul.mubr.bf16.vlgmr.msra.gmra.mrb[4].mxu0 %v4700_v1  ;;  %3014 = vmatprep.subr.msk.bf16.mxu1 %vm5236_vm3, %v2403_v16  ;;  %v2440_v22 = vsel %vm5237_vm15, %v2402_v5, 0  ;;  %vm2725_vm14 = vcmp.eq.s32.totalorder %v2699_v9, 1  ;;  %vm2727_vm15 = vcmp.eq.s32.totalorder %v2707_v36, 1  ;;  %v2639_v16 = vunpack.c.h.b16 %v4893_v28 }
 0x216   : > { %2595 = vmatpush1.bf16.msra.mxu1 %v2440_v22 }
 0x217   : > { %vm2641_vm7 = vcmp.ne.s32.totalorder %v2639_v16, 0 }
 0x218   : > { %v4917_v14 = vpop.permute.xlu0 %2407  ;;  %v2643_v5 = vsel %vm2641_vm7, 1, %v5238_v62 }
 0x219   : > { %2601 = vmatmul.mubr.bf16.vlgmr.msra.gmra.mrb[4].mxu1 %v4700_v1  ;;  %v2654_v1 = vsub.s32 4, %v5239_v34  ;;  %v2663_v22 = vrot.slane %v2643_v5, %v5240_v43  ;;  %v2667_v11 = vrot.slane %v2643_v5, %v2650_v29 }
 0x21b   : > { %v2655_v60 = vrot.slane %v2642_v8, %v2654_v1  ;;  %v2671_v3 = vrot.slane %v2643_v5, %v2654_v1  ;;  %vm2680_vm2 = vcmp.ne.s32.totalorder %v2663_v22, 0  ;;  %vm2681_vm12 = vcmp.ne.s32.totalorder %v2667_v11, 0 }
 0x21c   : > { %v2675_v8 = vrot.slane %v2643_v5, %v2658_v21  ;;  %v2688_v0 = vsel %vm2680_vm2, 1, %v5238_v62  ;;  %v2689_v28 = vsel %vm2681_vm12, 1, %v5238_v62 }
 0x21d   : > { %vm2678_vm9 = vcmp.ne.s32.totalorder %v2655_v60, 0  ;;  %vm2682_vm0 = vcmp.ne.s32.totalorder %v2671_v3, 0  ;;  %v2711_v27 = vrot.slane %v2688_v0, %v5240_v43  ;;  %v2715_v29 = vrot.slane %v2689_v28, %v5240_v43 }
 0x21e   : > { %v2686_v33 = vsel %vm2678_vm9, 1, %v5238_v62  ;;  %v2690_v60 = vsel %vm2682_vm0, 1, %v5238_v62  ;;  %vm2683_vm4 = vcmp.ne.s32.totalorder %v2675_v8, 0 }
 0x21f   : > { %v2703_v53 = vrot.slane %v2686_v33, %v5240_v43  ;;  %v2719_v21 = vrot.slane %v2690_v60, %v5240_v43  ;;  %v2691_v23 = vsel %vm2683_vm4, 1, %v5238_v62  ;;  %vm2728_vm13 = vcmp.eq.s32.totalorder %v2711_v27, 1 }
 0x221   : > { %vm2726_vm5 = vcmp.eq.s32.totalorder %v2703_v53, 1 }
 0x280   : > { %v2479_v63 = vpop.f32.mrb[0].mxu0 }
 0x281   : > { %v2480_v58 = vadd.f32 %v2479_v63, %v4917_v14  ;;  %v2481_v45 = vpop.f32.mrb[1].mxu0 }
 0x282   : > { %v2482_v57 = vadd.f32 %v2481_v45, %v4917_v14  ;;  %v2483_v6 = vpop.f32.mrb[2].mxu0 }
 0x283   : > { %vm2610_vm8 = vcmp.gt.f32.partialorder %v2480_v58, 0.0  ;;  %v2619_v39 = vmul.f32 %v4919_v10, %v2480_v58  ;;  %v2484_v49 = vpop.f32.mrb[3].mxu0  ;;  %v2723_v6 = vrot.slane %v2691_v23, %v5240_v43 }
 0x284   : > { %vm2611_vm1 = vcmp.gt.f32.partialorder %v2482_v57, 0.0  ;;  %v2620_v30 = vmul.f32 %v4919_v10, %v2482_v57 }
 0x285   : > { %v2627_v32 = vsel %vm2610_vm8, %v2480_v58, %v2619_v39 }
 0x286   : > { %v2732_v25 = vsel %vm2724_vm11, %v2627_v32, 0.0  ;;  %v2628_v42 = vsel %vm2611_vm1, %v2482_v57, %v2620_v30  ;;  %v2520_v31 = vpop.f32.mrb[0].mxu1  ;;  %vm2729_vm11 = vcmp.eq.s32.totalorder %v2715_v29, 1  ;;  %vm4966_vm1 = vcmp.eq.s32.totalorder %v2719_v21, 1 }
 0x287   : > { %v2789_v51 = vmul.f32 %v2732_v25, %v2732_v25  ;;  %v2733_v15 = vsel %vm2725_vm14, %v2628_v42, 0.0  ;;  %v2521_v50 = vadd.f32 %v2520_v31, %v4917_v14  ;;  %v2522_v52 = vpop.f32.mrb[1].mxu1 }
 0x288   : > { %v3052_v46 = vpack.c.bf16 %v2733_v15, %v2732_v25  ;;  %v2777_v26 = vadd.f32 %v2733_v15, %v2732_v25  ;;  %v2790_v59 = vmul.f32 %v2733_v15, %v2733_v15  ;;  %v2523_v24 = vadd.f32 %v2522_v52, %v4917_v14  ;;  %v2524_v47 = vpop.f32.mrb[2].mxu1 }
 0x289   : > { %vm2612_vm10 = vcmp.gt.f32.partialorder %v2521_v50, 0.0  ;;  %v2621_v38 = vmul.f32 %v4919_v10, %v2521_v50  ;;  %v2525_v61 = vpop.f32.mrb[3].mxu1 }
 0x28a   : > { %2772 = vst [vmem:[%s4936_s27] sm:$0xff] %v3052_v46  ;;  %v2797_v41 = vadd.f32 %v2790_v59, %v2789_v51  ;;  %vm2613_vm3 = vcmp.gt.f32.partialorder %v2523_v24, 0.0  ;;  %v2622_v44 = vmul.f32 %v4919_v10, %v2523_v24 }
 0x28b   : > { %v2629_v4 = vsel %vm2612_vm10, %v2521_v50, %v2621_v38 }
 0x28c   : > { %v2734_v48 = vsel %vm2726_vm5, %v2629_v4, 0.0  ;;  %v2630_v40 = vsel %vm2613_vm3, %v2523_v24, %v2622_v44  ;;  %vm2731_vm5 = vcmp.eq.s32.totalorder %v2723_v6, 1  ;;  %v2776_v4 = vld [vmem:[%s4915_s20] sm:$0xff]  ;;  %vm2807_vm3 = vcmask 15368  }
 0x28d   : > { %v2778_v13 = vadd.f32 %v2777_v26, %v2734_v48  ;;  %v2791_v17 = vmul.f32 %v2734_v48, %v2734_v48  ;;  %v2735_v18 = vsel %vm2727_vm15, %v2630_v40, 0.0 }
 0x28e   : > { %v3053_v37 = vpack.c.bf16 %v2735_v18, %v2734_v48  ;;  %v2792_v20 = vmul.f32 %v2735_v18, %v2735_v18 }
 0x28f   : > { %v2798_v56 = vadd.f32 %v2797_v41, %v2791_v17  ;;  %v2779_v19 = vadd.f32 %v2778_v13, %v2735_v18 }
 0x290   : > { %2773 = vst [vmem:[%s4936_s27 + $0x8] sm:$0xff] %v3053_v37 }
 0x291   : > { %v2799_v7 = vadd.f32 %v2798_v56, %v2792_v20 }
 0x2e8   : > { %v2561_v55 = vpop.f32.mrb[4].mxu0 }
 0x2e9   : > { %v2562_v1 = vadd.f32 %v2561_v55, %v4917_v14  ;;  %v2563_v54 = vpop.f32.mrb[5].mxu0 }
 0x2ea   : > { %v2564_v2 = vadd.f32 %v2563_v54, %v4917_v14  ;;  %v2565_v34 = vpop.f32.mrb[6].mxu0 }
 0x2eb   : > { %vm2614_vm9 = vcmp.gt.f32.partialorder %v2562_v1, 0.0  ;;  %v2623_v63 = vmul.f32 %v4919_v10, %v2562_v1  ;;  %v2566_v9 = vpop.f32.mrb[7].mxu0 }
 0x2ec   : > { %vm2615_vm8 = vcmp.gt.f32.partialorder %v2564_v2, 0.0  ;;  %v2624_v12 = vmul.f32 %v4919_v10, %v2564_v2  ;;  %v2602_v58 = vpop.f32.mrb[4].mxu1 }
 0x2ed   : > { %v2631_v45 = vsel %vm2614_vm9, %v2562_v1, %v2623_v63  ;;  %v2603_v57 = vadd.f32 %v2602_v58, %v4917_v14  ;;  %v2604_v33 = vpop.f32.mrb[5].mxu1 }
 0x2ee   : > { %v2736_v39 = vsel %vm2728_vm13, %v2631_v45, 0.0  ;;  %v2632_v35 = vsel %vm2615_vm8, %v2564_v2, %v2624_v12  ;;  %v2605_v49 = vadd.f32 %v2604_v33, %v4917_v14  ;;  %v2606_v30 = vpop.f32.mrb[6].mxu1 }
 0x2ef   : > { %v2780_v32 = vadd.f32 %v2779_v19, %v2736_v39  ;;  %v2793_v53 = vmul.f32 %v2736_v39, %v2736_v39  ;;  %v2737_v25 = vsel %vm2729_vm11, %v2632_v35, 0.0  ;;  %vm2616_vm14 = vcmp.gt.f32.partialorder %v2603_v57, 0.0  ;;  %v2607_v42 = vpop.f32.mrb[7].mxu1 }
 0x2f0   : > { %v3054_v31 = vpack.c.bf16 %v2737_v25, %v2736_v39  ;;  %v2794_v36 = vmul.f32 %v2737_v25, %v2737_v25  ;;  %v2625_v51 = vmul.f32 %v4919_v10, %v2603_v57  ;;  %vm2617_vm10 = vcmp.gt.f32.partialorder %v2605_v49, 0.0 }
 0x2f1   : > { %v2626_v43 = vmul.f32 %v4919_v10, %v2605_v49  ;;  %v2781_v15 = vadd.f32 %v2780_v32, %v2737_v25  ;;  %v2800_v50 = vadd.f32 %v2799_v7, %v2793_v53 }
 0x2f2   : > { %2774 = vst [vmem:[%s4936_s27 + $0x10] sm:$0xff] %v3054_v31  ;;  %v2633_v14 = vsel %vm2616_vm14, %v2603_v57, %v2625_v51 }
 0x2f3   : > { %v2738_v52 = vsel %vm4966_vm1, %v2633_v14, 0.0  ;;  %v2634_v46 = vsel %vm2617_vm10, %v2605_v49, %v2626_v43  ;;  %v2801_v26 = vadd.f32 %v2800_v50, %v2794_v36 }
 0x2f4   : > { %v2739_v59 = vsel %vm2731_vm5, %v2634_v46, 0.0  ;;  %v2782_v24 = vadd.f32 %v2781_v15, %v2738_v52  ;;  %v2795_v47 = vmul.f32 %v2738_v52, %v2738_v52 }
 0x2f5   : > { %v3055_v38 = vpack.c.bf16 %v2739_v59, %v2738_v52  ;;  %v2796_v10 = vmul.f32 %v2739_v59, %v2739_v59 }
 0x2f6   : > { %v2783_v61 = vadd.f32 %v2782_v24, %v2739_v59  ;;  %v2802_v41 = vadd.f32 %v2801_v26, %v2795_v47 }
 0x2f7   : > { %2775 = vst [vmem:[%s4936_s27 + $0x18] sm:$0xff] %v3055_v38 }
 0x2f8   : > { %2784 = vadd.xlane.f32.xlu1 %v2783_v61  ;;  %v2803_v44 = vadd.f32 %v2802_v41, %v2796_v10 }
 0x2fa   : > { %2804 = vadd.xlane.f32.xlu0 %v2803_v44 }
 0x385   : > { %v2785_v48 = vpop.xlane.xlu1 %2784 }
 0x386   : > { %v2786_v40 = vadd.f32 %v2785_v48, %v2776_v4 }
 0x387   : > { %v2805_v13 = vpop.xlane.xlu0 %2804 }
 0x388   : > { %2787 = vst.msk [vmem:[%s4915_s20] sm:$0xff] %vm1482_vm6, %v2786_v40 }
 0x38f   : > { %v2788_v17 = vld [vmem:[%s4915_s20] sm:$0xff] }
 0x390   : > { %v2806_v18 = vadd.f32 %v2805_v13, %v2788_v17 }
 0x392   : > { %2808 = vst.msk [vmem:[%s4915_s20] sm:$0xff] %vm2807_vm3, %v2806_v18 }
 0x393 PF: > { %s24_s25 = sadd.s32 1, %s3688_s25   ;;  %s5244_s23 = smov %s3684_s24 }
 0x394   : > { %p21_p8 = scmp.ge.s32.totalorder %s24_s25, 4   ;;  %s5245_s24 = smov %s5247_s10 }
 0x396   :  { %23 = sbr.rel (!%p21_p8) target bundleno = 2 (0x2), region = 125 }

</bundles_post_ra>
